<compile_context>
chip_gen: v7x
topology: tpu7x:2x2x1
jax: 0.10.0
libtpu: 0.0.40
codegen_flags: <defaults>
</compile_context>

<pallas_src>
import functools

import jax
import jax.numpy as jnp
from jax.experimental import pallas as pl
from jax.experimental.pallas import tpu as pltpu


def discriminator_kernel(x_ref,
                         w1_ref, b1_ref,
                         w2_ref, b2_ref,
                         w3_ref, b3_ref,
                         w4_ref, b4_ref,
                         o_ref,
                         *, bf16_elem):
    bf16 = jnp.bfloat16

    def dense_lrelu(h, w_ref, b_ref):
        # MXU matmul: bf16 inputs, f32 accumulation.
        y = jnp.dot(h.astype(bf16), w_ref[...],
                    preferred_element_type=jnp.float32)
        if bf16_elem:                      # v6e / v7x: bf16-native VALU
            y = y.astype(bf16)
        y = y + b_ref[...]
        return jnp.maximum(y, 0.2 * y)     # LeakyReLU(0.2): mul + max only

    h = dense_lrelu(x_ref[...], w1_ref, b1_ref)   # (TB, 512)
    h = dense_lrelu(h, w2_ref, b2_ref)            # (TB, 256)
    h = dense_lrelu(h, w3_ref, b3_ref)            # (TB, 128)

    # Final Linear(128, 1): contract the 128-feature axis against the (1, 128)
    # weight row so the logits land on the lane axis -> lane-dense (1, TB).
    logits = jax.lax.dot_general(
        w4_ref[...].astype(bf16), h.astype(bf16),
        dimension_numbers=(((1,), (1,)), ((), ())),
        preferred_element_type=jnp.float32)        # (1, TB)
    logits = logits + b4_ref[...]                  # (1, 1) broadcast

    # Sigmoid in f32 (exact; this tile is only TB elements).
    o_ref[...] = 1.0 / (1.0 + jnp.exp(-logits))


def _bf16_elementwise_ok():
    """bf16 VALU elementwise only on v6e / v7x (v5e VPU has no bf16)."""
    try:
        kind = jax.devices()[0].device_kind.lower()
    except Exception:
        return False
    return ("v6" in kind) or ("v7" in kind)


def _pick_batch_tile(batch):
    # Biggest tile (amortize the ~0.35 us/step overhead, larger MXU M) while
    # keeping >= 2 grid steps when possible so both v7x TensorCores get work.
    half = pl.cdiv(batch, 2)
    tb = pl.cdiv(half, 128) * 128
    return int(max(128, min(1024, tb)))


def discriminator_forward(x, params, *, tb=None):
    """x: (B, input_size) f32 or bf16; params: w1..w4 (fan_in, fan_out), b1..b4."""
    B, d_in = x.shape
    if tb is None:
        tb = _pick_batch_tile(B)
    nb = pl.cdiv(B, tb)
    b_pad = nb * tb
    if b_pad != B:
        x = jnp.pad(x, ((0, b_pad - B), (0, 0)))
    # NOTE: x is consumed in whatever dtype the producer emits (the in-kernel
    # .astype(bf16) is a no-op for bf16 inputs).  No standalone wrapper cast.

    bf16_elem = _bf16_elementwise_ok()
    ew_dtype = jnp.bfloat16 if bf16_elem else jnp.float32

    # MXU weights in bf16 once in the wrapper (halves weight DMA).
    w1 = params["w1"].astype(jnp.bfloat16)
    w2 = params["w2"].astype(jnp.bfloat16)
    w3 = params["w3"].astype(jnp.bfloat16)
    b1 = params["b1"].reshape(1, -1).astype(ew_dtype)
    b2 = params["b2"].reshape(1, -1).astype(ew_dtype)
    b3 = params["b3"].reshape(1, -1).astype(ew_dtype)
    # Final-layer params stay f32 (tiny; cast to bf16 in-kernel for the MXU).
    w4_row = params["w4"].reshape(1, 128).astype(jnp.float32)
    b4 = params["b4"].reshape(1, 1).astype(jnp.float32)

    in_specs = [
        pl.BlockSpec((tb, d_in), lambda i: (i, 0)),   # x: batch-tiled
        pl.BlockSpec(w1.shape, lambda i: (0, 0)),     # weights resident
        pl.BlockSpec(b1.shape, lambda i: (0, 0)),
        pl.BlockSpec(w2.shape, lambda i: (0, 0)),
        pl.BlockSpec(b2.shape, lambda i: (0, 0)),
        pl.BlockSpec(w3.shape, lambda i: (0, 0)),
        pl.BlockSpec(b3.shape, lambda i: (0, 0)),
        pl.BlockSpec(w4_row.shape, lambda i: (0, 0)),
        pl.BlockSpec(b4.shape, lambda i: (0, 0)),
    ]
    # Lane-dense output: one (1, TB) row per grid step.
    out_spec = pl.BlockSpec((1, tb), lambda i: (i, 0))

    flops = 2 * b_pad * (d_in * 512 + 512 * 256 + 256 * 128 + 128)
    param_bytes = sum(int(a.size) * a.dtype.itemsize
                      for a in (w1, b1, w2, b2, w3, b3, w4_row, b4))
    bytes_accessed = int(x.size) * x.dtype.itemsize + param_bytes + b_pad * 4
    cost = pl.CostEstimate(flops=flops, transcendentals=b_pad,
                           bytes_accessed=bytes_accessed)

    out_rows = pl.pallas_call(
        functools.partial(discriminator_kernel, bf16_elem=bf16_elem),
        out_shape=jax.ShapeDtypeStruct((nb, tb), jnp.float32),
        grid=(nb,),
        in_specs=in_specs,
        out_specs=out_spec,
        compiler_params=pltpu.CompilerParams(
            dimension_semantics=("parallel",)),
        cost_estimate=cost,
    )(x, w1, b1, w2, b2, w3, b3, w4_row, b4)

    return out_rows.reshape(-1)[:B].reshape(B, 1)


def init_params(key, input_size):
    """Deterministic init mimicking nn.Linear's default U(-1/sqrt(fan_in), +...)."""
    dims = [(input_size, 512), (512, 256), (256, 128), (128, 1)]
    params = {}
    for i, (fan_in, fan_out) in enumerate(dims, start=1):
        key, kw, kb = jax.random.split(key, 3)
        bound = 1.0 / jnp.sqrt(float(fan_in))
        params[f"w{i}"] = jax.random.uniform(
            kw, (fan_in, fan_out), jnp.float32, minval=-bound, maxval=bound)
        params[f"b{i}"] = jax.random.uniform(
            kb, (1, fan_out), jnp.float32, minval=-bound, maxval=bound)
    return params


def reference_forward(x, params, *, bf16_elem):
    """Pure-JAX reference mirroring the kernel's mixed precision."""
    bf16 = jnp.bfloat16
    h = x
    for i in (1, 2, 3):
        y = jnp.dot(h.astype(bf16), params[f"w{i}"].astype(bf16),
                    preferred_element_type=jnp.float32)
        if bf16_elem:
            y = y.astype(bf16) + params[f"b{i}"].astype(bf16)
        else:
            y = y + params[f"b{i}"]
        h = jnp.maximum(y, 0.2 * y)
    logits = jnp.dot(h.astype(bf16), params["w4"].astype(bf16),
                     preferred_element_type=jnp.float32) + params["b4"]
    return 1.0 / (1.0 + jnp.exp(-logits))


def reference_forward_f32(x, params):
    """Full-precision reference of the original nn.Module semantics."""
    h = x
    for i in (1, 2, 3):
        h = h @ params[f"w{i}"] + params[f"b{i}"]
        h = jnp.maximum(h, 0.2 * h)
    logits = h @ params["w4"] + params["b4"]
    return jax.nn.sigmoid(logits)


if __name__ == "__main__":
    key = jax.random.PRNGKey(0)
    key, kx = jax.random.split(key)

    batch = 8
    input_size = 64  # small but consistent with Linear(input_size, 512)

    params = init_params(key, input_size)
    x = jax.random.normal(kx, (batch, input_size), jnp.float32)

    out = discriminator_forward(x, params)
    out = jax.block_until_ready(out)
    assert out.shape == (batch, 1), out.shape

    # Mixed-precision mirror (tight) and pure-f32 module semantics (loose,
    # covers bf16 matmul/activation rounding).
    ref = reference_forward(x, params, bf16_elem=_bf16_elementwise_ok())
    ref32 = reference_forward_f32(x, params)
    assert jnp.allclose(out, ref, atol=2e-3, rtol=2e-3), (out, ref)
    assert jnp.allclose(out, ref32, atol=3e-2, rtol=3e-2), (out, ref32)

    print("KERNEL_OK")
</pallas_src>

<mosaic_0001>
module attributes {stable_mosaic.version = 11 : i64} {
  func.func @discriminator_kernel(%arg0: i32, %arg1: memref<128x64xf32, #tpu.memory_space<vmem>>, %arg2: memref<64x512xbf16, #tpu.memory_space<vmem>>, %arg3: memref<1x512xf32, #tpu.memory_space<vmem>>, %arg4: memref<512x256xbf16, #tpu.memory_space<vmem>>, %arg5: memref<1x256xf32, #tpu.memory_space<vmem>>, %arg6: memref<256x128xbf16, #tpu.memory_space<vmem>>, %arg7: memref<1x128xf32, #tpu.memory_space<vmem>>, %arg8: memref<1x128xf32, #tpu.memory_space<vmem>>, %arg9: memref<1x1xf32, #tpu.memory_space<vmem>>, %arg10: memref<1x128xf32, #tpu.memory_space<vmem>>) attributes {dimension_semantics = [#tpu.dimension_semantics<parallel>], iteration_bounds = array<i64: 1>, scalar_prefetch = 0 : i64, scratch_operands = 0 : i64, tpu.core_type = #tpu.core_type<tc>, window_params = [{transform_indices = @transform_0, window_bounds = array<i64: 128, 64>}, {pipeline_mode = #tpu.pipeline_mode<synchronous>, transform_indices = @transform_1, window_bounds = array<i64: 64, 512>}, {pipeline_mode = #tpu.pipeline_mode<synchronous>, transform_indices = @transform_2, window_bounds = array<i64: 1, 512>}, {pipeline_mode = #tpu.pipeline_mode<synchronous>, transform_indices = @transform_3, window_bounds = array<i64: 512, 256>}, {pipeline_mode = #tpu.pipeline_mode<synchronous>, transform_indices = @transform_4, window_bounds = array<i64: 1, 256>}, {pipeline_mode = #tpu.pipeline_mode<synchronous>, transform_indices = @transform_5, window_bounds = array<i64: 256, 128>}, {pipeline_mode = #tpu.pipeline_mode<synchronous>, transform_indices = @transform_6, window_bounds = array<i64: 1, 128>}, {pipeline_mode = #tpu.pipeline_mode<synchronous>, transform_indices = @transform_7, window_bounds = array<i64: 1, 128>}, {pipeline_mode = #tpu.pipeline_mode<synchronous>, transform_indices = @transform_8, window_bounds = array<i64: 1, 1>}, {transform_indices = @transform_9, window_bounds = array<i64: 1, 128>}]} {
    %c0 = arith.constant 0 : index
    %c0_0 = arith.constant 0 : index
    %0 = vector.load %arg1[%c0, %c0_0] : memref<128x64xf32, #tpu.memory_space<vmem>>, vector<128x64xf32>
    %1 = arith.truncf %0 : vector<128x64xf32> to vector<128x64xbf16>
    %c0_1 = arith.constant 0 : index
    %c0_2 = arith.constant 0 : index
    %2 = vector.load %arg2[%c0_1, %c0_2] : memref<64x512xbf16, #tpu.memory_space<vmem>>, vector<64x512xbf16>
    %cst = arith.constant dense<0.000000e+00> : vector<128x512xf32>
    %3 = tpu.matmul %1, %2, %cst {dimension_numbers = #tpu.dot_dimension_numbers<[1], [0], [0], [1], [0, 0, 1, 1], [], []>} : vector<128x64xbf16>, vector<64x512xbf16>, vector<128x512xf32> -> vector<128x512xf32>
    %c0_3 = arith.constant 0 : index
    %c0_4 = arith.constant 0 : index
    %4 = vector.load %arg3[%c0_3, %c0_4] : memref<1x512xf32, #tpu.memory_space<vmem>>, vector<1x512xf32>
    %5 = vector.broadcast %4 : vector<1x512xf32> to vector<128x512xf32>
    %6 = arith.addf %3, %5 : vector<128x512xf32>
    %cst_5 = arith.constant 2.000000e-01 : f32
    %7 = vector.broadcast %cst_5 : f32 to vector<128x512xf32>
    %8 = arith.mulf %7, %6 : vector<128x512xf32>
    %9 = arith.maximumf %6, %8 : vector<128x512xf32>
    %10 = arith.truncf %9 : vector<128x512xf32> to vector<128x512xbf16>
    %c0_6 = arith.constant 0 : index
    %c0_7 = arith.constant 0 : index
    %11 = vector.load %arg4[%c0_6, %c0_7] : memref<512x256xbf16, #tpu.memory_space<vmem>>, vector<512x256xbf16>
    %cst_8 = arith.constant dense<0.000000e+00> : vector<128x256xf32>
    %12 = tpu.matmul %10, %11, %cst_8 {dimension_numbers = #tpu.dot_dimension_numbers<[1], [0], [0], [1], [0, 0, 1, 1], [], []>} : vector<128x512xbf16>, vector<512x256xbf16>, vector<128x256xf32> -> vector<128x256xf32>
    %c0_9 = arith.constant 0 : index
    %c0_10 = arith.constant 0 : index
    %13 = vector.load %arg5[%c0_9, %c0_10] : memref<1x256xf32, #tpu.memory_space<vmem>>, vector<1x256xf32>
    %14 = vector.broadcast %13 : vector<1x256xf32> to vector<128x256xf32>
    %15 = arith.addf %12, %14 : vector<128x256xf32>
    %cst_11 = arith.constant 2.000000e-01 : f32
    %16 = vector.broadcast %cst_11 : f32 to vector<128x256xf32>
    %17 = arith.mulf %16, %15 : vector<128x256xf32>
    %18 = arith.maximumf %15, %17 : vector<128x256xf32>
    %19 = arith.truncf %18 : vector<128x256xf32> to vector<128x256xbf16>
    %c0_12 = arith.constant 0 : index
    %c0_13 = arith.constant 0 : index
    %20 = vector.load %arg6[%c0_12, %c0_13] : memref<256x128xbf16, #tpu.memory_space<vmem>>, vector<256x128xbf16>
    %cst_14 = arith.constant dense<0.000000e+00> : vector<128x128xf32>
    %21 = tpu.matmul %19, %20, %cst_14 {dimension_numbers = #tpu.dot_dimension_numbers<[1], [0], [0], [1], [0, 0, 1, 1], [], []>} : vector<128x256xbf16>, vector<256x128xbf16>, vector<128x128xf32> -> vector<128x128xf32>
    %c0_15 = arith.constant 0 : index
    %c0_16 = arith.constant 0 : index
    %22 = vector.load %arg7[%c0_15, %c0_16] : memref<1x128xf32, #tpu.memory_space<vmem>>, vector<1x128xf32>
    %23 = vector.broadcast %22 : vector<1x128xf32> to vector<128x128xf32>
    %24 = arith.addf %21, %23 : vector<128x128xf32>
    %cst_17 = arith.constant 2.000000e-01 : f32
    %25 = vector.broadcast %cst_17 : f32 to vector<128x128xf32>
    %26 = arith.mulf %25, %24 : vector<128x128xf32>
    %27 = arith.maximumf %24, %26 : vector<128x128xf32>
    %c0_18 = arith.constant 0 : index
    %c0_19 = arith.constant 0 : index
    %28 = vector.load %arg8[%c0_18, %c0_19] : memref<1x128xf32, #tpu.memory_space<vmem>>, vector<1x128xf32>
    %29 = arith.truncf %28 : vector<1x128xf32> to vector<1x128xbf16>
    %30 = arith.truncf %27 : vector<128x128xf32> to vector<128x128xbf16>
    %cst_20 = arith.constant dense<0.000000e+00> : vector<1x128xf32>
    %31 = tpu.matmul %29, %30, %cst_20 {dimension_numbers = #tpu.dot_dimension_numbers<[1], [1], [0], [0], [0, 0, 1, 0], [], []>} : vector<1x128xbf16>, vector<128x128xbf16>, vector<1x128xf32> -> vector<1x128xf32>
    %c0_21 = arith.constant 0 : index
    %c0_22 = arith.constant 0 : index
    %32 = vector.load %arg9[%c0_21, %c0_22] : memref<1x1xf32, #tpu.memory_space<vmem>>, vector<1x1xf32>
    %33 = vector.broadcast %32 : vector<1x1xf32> to vector<1x128xf32>
    %34 = arith.addf %31, %33 : vector<1x128xf32>
    %cst_23 = arith.constant 0.000000e+00 : f32
    %35 = vector.broadcast %cst_23 : f32 to vector<1x128xf32>
    %36 = arith.subf %35, %34 : vector<1x128xf32>
    %37 = math.exp %36 : vector<1x128xf32>
    %cst_24 = arith.constant 1.000000e+00 : f32
    %38 = vector.broadcast %cst_24 : f32 to vector<1x128xf32>
    %39 = arith.addf %38, %37 : vector<1x128xf32>
    %cst_25 = arith.constant 1.000000e+00 : f32
    %40 = vector.broadcast %cst_25 : f32 to vector<1x128xf32>
    %41 = arith.divf %40, %39 : vector<1x128xf32>
    %c0_26 = arith.constant 0 : index
    %c0_27 = arith.constant 0 : index
    %42 = vector.load %arg10[%c0_26, %c0_27] : memref<1x128xf32, #tpu.memory_space<vmem>>, vector<1x128xf32>
    tpu.vector_store %arg10[%c0_26, %c0_27], %41 {strides = array<i32>} : memref<1x128xf32, #tpu.memory_space<vmem>>, vector<1x128xf32>,
    return
  }
  func.func @transform_0(%arg0: i32) -> (i32, i32) {
    %c0_i32 = arith.constant 0 : i32
    %c0_i32_0 = arith.constant 0 : i32
    return %arg0, %c0_i32 : i32, i32
  }
  func.func @transform_1(%arg0: i32) -> (i32, i32) {
    %c0_i32 = arith.constant 0 : i32
    %c0_i32_0 = arith.constant 0 : i32
    %c0_i32_1 = arith.constant 0 : i32
    return %c0_i32, %c0_i32_0 : i32, i32
  }
  func.func @transform_2(%arg0: i32) -> (i32, i32) {
    %c0_i32 = arith.constant 0 : i32
    %c0_i32_0 = arith.constant 0 : i32
    %c0_i32_1 = arith.constant 0 : i32
    return %c0_i32, %c0_i32_0 : i32, i32
  }
  func.func @transform_3(%arg0: i32) -> (i32, i32) {
    %c0_i32 = arith.constant 0 : i32
    %c0_i32_0 = arith.constant 0 : i32
    %c0_i32_1 = arith.constant 0 : i32
    return %c0_i32, %c0_i32_0 : i32, i32
  }
  func.func @transform_4(%arg0: i32) -> (i32, i32) {
    %c0_i32 = arith.constant 0 : i32
    %c0_i32_0 = arith.constant 0 : i32
    %c0_i32_1 = arith.constant 0 : i32
    return %c0_i32, %c0_i32_0 : i32, i32
  }
  func.func @transform_5(%arg0: i32) -> (i32, i32) {
    %c0_i32 = arith.constant 0 : i32
    %c0_i32_0 = arith.constant 0 : i32
    %c0_i32_1 = arith.constant 0 : i32
    return %c0_i32, %c0_i32_0 : i32, i32
  }
  func.func @transform_6(%arg0: i32) -> (i32, i32) {
    %c0_i32 = arith.constant 0 : i32
    %c0_i32_0 = arith.constant 0 : i32
    %c0_i32_1 = arith.constant 0 : i32
    return %c0_i32, %c0_i32_0 : i32, i32
  }
  func.func @transform_7(%arg0: i32) -> (i32, i32) {
    %c0_i32 = arith.constant 0 : i32
    %c0_i32_0 = arith.constant 0 : i32
    %c0_i32_1 = arith.constant 0 : i32
    return %c0_i32, %c0_i32_0 : i32, i32
  }
  func.func @transform_8(%arg0: i32) -> (i32, i32) {
    %c0_i32 = arith.constant 0 : i32
    %c0_i32_0 = arith.constant 0 : i32
    %c0_i32_1 = arith.constant 0 : i32
    return %c0_i32, %c0_i32_0 : i32, i32
  }
  func.func @transform_9(%arg0: i32) -> (i32, i32) {
    %c0_i32 = arith.constant 0 : i32
    %c0_i32_0 = arith.constant 0 : i32
    return %arg0, %c0_i32 : i32, i32
  }
}

</mosaic_0001>

<bundles_post_ra>
// kernel: tpu_custom_call.1
= control target key start
LH: loop header
LB: loop body
LE: loop exit
PB: predicated region body
PF: predicated region fallthrough
CT: control target
= control target key end

     0   :  { %s2585_s0 = inlined_call_operand.vmem [shape: f32[128,64], index: 0, kind: input, shape index: {}]   ;;  %s2586_s1 = inlined_call_operand.vmem [shape: bf16[64,512], index: 1, kind: input, shape index: {}]   ;;  %s2587_s2 = inlined_call_operand.vmem [shape: f32[1,512], index: 2, kind: input, shape index: {}]   ;;  %s2588_s3 = inlined_call_operand.hbm [shape: bf16[512,256], index: 3, kind: input, shape index: {}]   ;;  %s2589_s4 = inlined_call_operand.vmem [shape: f32[1,256], index: 4, kind: input, shape index: {}]   ;;  %s2590_s5 = inlined_call_operand.hbm [shape: bf16[256,128], index: 5, kind: input, shape index: {}]   ;;  %s2591_s6 = inlined_call_operand.vmem [shape: f32[1,128], index: 6, kind: input, shape index: {}]   ;;  %s2592_s7 = inlined_call_operand.vmem [shape: f32[1,128], index: 7, kind: input, shape index: {}]   ;;  %s2593_s8 = inlined_call_operand.<no memory space> [shape: f32[1,1], index: 8, kind: input, shape index: {}]   ;;  %s2594_s9 = inlined_call_operand.hbm [shape: f32[1,128], index: 9, kind: output, shape index: {}]  }
   0x1   :  { %v14_v0 = vstv %s2593_s8 }
   0x2   :  { %15 = vst [vmem:[#allocation2] sm:$0x1] %v14_v0 }
   0x3   :  { %16 = vsyncpa [#allocation4], 0 }
   0x4   :  { %17 = vsyncpa [#allocation7], 0 }
   0x5   :  { %18 = vsyncpa [#allocation5], 0  ;;  %s2159_s11 = smov [#allocation3]   ;;  %s2087_s15 = scalar_lea.hbm %s2588_s3, 8192 }
   0x6   :  { %s30_s12 = sshll.u32 %s2159_s11, 4  ;;  %p2088_p0 = scmp.ne.s32.totalorder %s2588_s3, %s2087_s15  ;;  %s31_s12 = int_to_ptr.vmem [resolvable:$true] %s30_s12 }
   0x7   :  { %p2091_p1 = scmp.lt.u32.totalorder %s2087_s15, %s2588_s3 }
   0x9   :  { %p2093_p2 = pnand %p2091_p1, %p2088_p0 }
   0xb   :  { %2096 = shalt.err (!%p2093_p2)
}
   0xc   :  { %s2097_s8 = scalar_lea.vmem %s31_s12, 8192  ;;  %p2102_p4 = scmp.lt.s32.totalorder %s31_s12, %s31_s12 }
   0xd   :  { %p2098_p3 = scmp.ne.s32.totalorder %s31_s12, %s2097_s8  ;;  %p2103_p5 = scmp.lt.s32.totalorder %s2097_s8, %s2097_s8 }
   0xf   :  { %p2104_p6 = por %p2103_p5, %p2102_p4 }
  0x11   :  { %p2105_p7 = pnand %p2104_p6, %p2098_p3 }
  0x13   :  { %2108 = shalt.err (!%p2105_p7)
}
  0x14   :  { %s2160_s20 = smov 128   ;;  %s2161_s21 = smov 8  }
  0x15   :  { %36 = dma.hbm_to_vmem [thread:$0]  %s2588_s3, 8192, %s31_s12, [#allocation4], %s2160_s20, %s2160_s20, %s2161_s21  }
  0x16   :  { %s2162_s24 = smov [#allocation6]   ;;  %s2109_s28 = scalar_lea.hbm %s2590_s5, 2048 }
  0x17   :  { %s44_s25 = sshll.u32 %s2162_s24, 4  ;;  %p2110_p8 = scmp.ne.s32.totalorder %s2590_s5, %s2109_s28  ;;  %s45_s25 = int_to_ptr.vmem [resolvable:$true] %s44_s25 }
  0x18   :  { %p2113_p9 = scmp.lt.u32.totalorder %s2109_s28, %s2590_s5 }
  0x1a   :  { %p2115_p10 = pnand %p2113_p9, %p2110_p8 }
  0x1c   :  { %2118 = shalt.err (!%p2115_p10)
}
  0x1d   :  { %s2119_s13 = scalar_lea.vmem %s45_s25, 2048  ;;  %p2124_p12 = scmp.lt.s32.totalorder %s45_s25, %s45_s25 }
  0x1e   :  { %p2120_p11 = scmp.ne.s32.totalorder %s45_s25, %s2119_s13  ;;  %p2125_p13 = scmp.lt.s32.totalorder %s2119_s13, %s2119_s13 }
  0x20   :  { %p2126_p0 = por %p2125_p13, %p2124_p12 }
  0x22   :  { %p2127_p1 = pnand %p2126_p0, %p2120_p11 }
  0x24   :  { %2130 = shalt.err (!%p2127_p1)
}
  0x25   :  { %s2163_s3 = smov 64   ;;  %s2164_s12 = smov 4  }
  0x26   :  { %50 = dma.hbm_to_vmem [thread:$0]  %s2590_s5, 2048, %s45_s25, [#allocation7], %s2163_s3, %s2163_s3, %s2164_s12  }
  0x27   :  { %2153 = dma.done.wait [#allocation4], 8192  }
  0x28   :  { %2154 = vsyncadd [#allocation4], 4294959104 }
  0x29   :  { %2155 = dma.done.wait [#allocation7], 2048  }
  0x2a   :  { %2156 = vsyncadd [#allocation7], 4294965248  ;;  %v2165_v1 = vmov 0   ;;  %v1947_v2 = vld [vmem:[%s2586_s1 + $0x4] ss:$16 sps:$4 sm:$0xff]   ;;  %v65_v13 = vld [vmem:[%s2585_s0 + $0x8] sm:$0xff] }
  0x2b   :  { %263 = vmatprep.mubr.bf16.mxu0 %v2165_v1  ;;  %376 = vmatprep.mubr.bf16.mxu1 %v2165_v1  ;;  %v1949_v3 = vld [vmem:[%s2586_s1] ss:$16 sps:$4 sm:$0xff]   ;;  %v1950_v4 = vld [vmem:[%s2586_s1 + $0x24] ss:$16 sps:$4 sm:$0xff]   ;;  %v1959_v11 = vld [vmem:[%s2586_s1 + $0xc] ss:$16 sps:$4 sm:$0xff]  }
  0x2c   :  { %1946 = vset.pattern.permute.xlu0 %v2165_v1  ;;  %231 = vmatprep.subr.bf16.mxu0 %v1947_v2  ;;  %v1952_v5 = vld [vmem:[%s2586_s1 + $0x20] ss:$16 sps:$4 sm:$0xff]   ;;  %v1953_v6 = vld [vmem:[%s2586_s1 + $0x44] ss:$16 sps:$4 sm:$0xff]   ;;  %v1961_v12 = vld [vmem:[%s2586_s1 + $0x8] ss:$16 sps:$4 sm:$0xff]  }
  0x2d   :  { %232 = vmatpush1.bf16.msra.mxu0 %v1949_v3  ;;  %v1955_v7 = vld [vmem:[%s2586_s1 + $0x40] ss:$16 sps:$4 sm:$0xff]   ;;  %v1956_v8 = vld [vmem:[%s2586_s1 + $0x64] ss:$16 sps:$4 sm:$0xff]   ;;  %v1962_v14 = vld [vmem:[%s2586_s1 + $0x2c] ss:$16 sps:$4 sm:$0xff]   ;;  %344 = vmatprep.subr.bf16.mxu1 %v1959_v11 }
  0x2e   :  { %233 = vmatprep.subr.bf16.mxu0 %v1950_v4  ;;  %v1958_v9 = vld [vmem:[%s2586_s1 + $0x60] ss:$16 sps:$4 sm:$0xff]   ;;  %345 = vmatpush1.bf16.msra.mxu1 %v1961_v12  ;;  %v1964_v15 = vld [vmem:[%s2586_s1 + $0x28] ss:$16 sps:$4 sm:$0xff]   ;;  %v1965_v17 = vld [vmem:[%s2586_s1 + $0x4c] ss:$16 sps:$4 sm:$0xff]   ;;  %v106_v12 = vlaneseq }
  0x2f   :  { %v64_v10 = vld [vmem:[%s2585_s0] sm:$0xff]  ;;  %346 = vmatprep.subr.bf16.mxu1 %v1962_v14  ;;  %vm206_vm0 = vcmask 523264   ;;  %v1967_v18 = vld [vmem:[%s2586_s1 + $0x48] ss:$16 sps:$4 sm:$0xff]   ;;  %v66_v20 = vld [vmem:[%s2585_s0 + $0x10] sm:$0xff]  ;;  %vm2167_vm1 = vmmov 0  }
  0x30   :  { %v80_v16 = vpack.c.bf16 %v65_v13, %v64_v10  ;;  %v1971_v19 = vld [vmem:[#allocation3] ss:$8 sps:$4 sm:$0xff]   ;;  %v1973_v21 = vld [vmem:[#allocation3 + $0x4] ss:$8 sps:$4 sm:$0xff]   ;;  %v1976_v23 = vld [vmem:[#allocation3 + $0x14] ss:$8 sps:$4 sm:$0xff]  }
  0x31   :  { %234 = vmatpush1.bf16.msra.mxu0 %v1952_v5  ;;  %v1968_v22 = vld [vmem:[%s2586_s1 + $0x6c] ss:$16 sps:$4 sm:$0xff]   ;;  %v1970_v25 = vld [vmem:[%s2586_s1 + $0x68] ss:$16 sps:$4 sm:$0xff]   ;;  %v68_v31 = vld [vmem:[%s2585_s0 + $0x20] sm:$0xff]  ;;  %v2375_v13 = vshrl.u32 %v106_v12, 7 }
  0x32   :  { %235 = vmatprep.subr.bf16.mxu0 %v1953_v6  ;;  %347 = vmatpush1.bf16.msra.mxu1 %v1964_v15  ;;  %v67_v24 = vld [vmem:[%s2585_s0 + $0x18] sm:$0xff]  ;;  %v1979_v27 = vld [vmem:[#allocation3 + $0x24] ss:$8 sps:$4 sm:$0xff]   ;;  %v1977_v29 = vld [vmem:[#allocation3 + $0x20] ss:$8 sps:$4 sm:$0xff]   ;;  %s2168_s11 = smov [#allocation8]  }
  0x33   :  { %348 = vmatprep.subr.bf16.mxu1 %v1965_v17  ;;  %v1974_v26 = vld [vmem:[#allocation3 + $0x10] ss:$8 sps:$4 sm:$0xff]   ;;  %v81_v28 = vpack.c.bf16 %v67_v24, %v66_v20  ;;  %v1982_v30 = vld [vmem:[#allocation3 + $0x34] ss:$8 sps:$4 sm:$0xff]   ;;  %v69_v32 = vld [vmem:[%s2585_s0 + $0x28] sm:$0xff]  ;;  %v112_v15 = vsub.s32 1, %v2375_v13 }
  0x34   :  { %v1980_v33 = vld [vmem:[#allocation3 + $0x30] ss:$8 sps:$4 sm:$0xff]   ;;  %v1985_v34 = vld [vmem:[#allocation3 + $0x44] ss:$8 sps:$4 sm:$0xff]   ;;  %v82_v35 = vpack.c.bf16 %v69_v32, %v68_v31  ;;  %v1983_v36 = vld [vmem:[#allocation3 + $0x40] ss:$8 sps:$4 sm:$0xff]  }
  0x35   :  { %236 = vmatpush1.bf16.msra.mxu0 %v1955_v7  ;;  %v70_v37 = vld [vmem:[%s2585_s0 + $0x30] sm:$0xff]  ;;  %v71_v38 = vld [vmem:[%s2585_s0 + $0x38] sm:$0xff]  ;;  %v1989_v43 = vld [vmem:[#allocation3 + $0x60] ss:$8 sps:$4 sm:$0xff]   ;;  %s1656_s13 = sshll.u32 %s2168_s11, 4  ;;  %s1657_s13 = int_to_ptr.vmem [resolvable:$true] %s1656_s13 }
  0x36   :  { %237 = vmatprep.subr.bf16.mxu0 %v1956_v8  ;;  %349 = vmatpush1.bf16.msra.mxu1 %v1967_v18  ;;  %v1988_v39 = vld [vmem:[#allocation3 + $0x54] ss:$8 sps:$4 sm:$0xff]   ;;  %v1986_v40 = vld [vmem:[#allocation3 + $0x50] ss:$8 sps:$4 sm:$0xff]   ;;  %v1991_v41 = vld [vmem:[#allocation3 + $0x64] ss:$8 sps:$4 sm:$0xff]   ;;  %v83_v42 = vpack.c.bf16 %v71_v38, %v70_v37  ;;  %p2136_p3 = scmp.lt.s32.totalorder %s1657_s13, %s1657_s13 }
  0x37   :  { %350 = vmatprep.subr.bf16.mxu1 %v1968_v22  ;;  %v1994_v44 = vld [vmem:[#allocation3 + $0x74] ss:$8 sps:$4 sm:$0xff]   ;;  %v73_v46 = vld [vmem:[%s2585_s0 + $0x48] sm:$0xff]  ;;  %v1992_v47 = vld [vmem:[#allocation3 + $0x70] ss:$8 sps:$4 sm:$0xff]   ;;  %s2135_s3 = scalar_lea.vmem %s1657_s13, 32 }
  0x38   :  { %v72_v45 = vld [vmem:[%s2585_s0 + $0x40] sm:$0xff]  ;;  %v74_v52 = vld [vmem:[%s2585_s0 + $0x50] sm:$0xff]  ;;  %v75_v53 = vld [vmem:[%s2585_s0 + $0x58] sm:$0xff] }
  0x39   :  { %238 = vmatpush1.bf16.msra.mxu0 %v1958_v9  ;;  %v1997_v48 = vld [vmem:[#allocation3 + $0x84] ss:$8 sps:$4 sm:$0xff]   ;;  %v84_v49 = vpack.c.bf16 %v73_v46, %v72_v45  ;;  %v1995_v50 = vld [vmem:[#allocation3 + $0x80] ss:$8 sps:$4 sm:$0xff]   ;;  %v2000_v51 = vld [vmem:[#allocation3 + $0x94] ss:$8 sps:$4 sm:$0xff]   ;;  %v85_v56 = vpack.c.bf16 %v75_v53, %v74_v52 }
  0x3a   :  { %1013 = vmatprep.subr.bf16.mxu0 %v1973_v21  ;;  %351 = vmatpush1.bf16.msra.mxu1 %v1970_v25  ;;  %v1998_v54 = vld [vmem:[#allocation3 + $0x90] ss:$8 sps:$4 sm:$0xff]   ;;  %v2003_v55 = vld [vmem:[#allocation3 + $0xa4] ss:$8 sps:$4 sm:$0xff]   ;;  %v2001_v57 = vld [vmem:[#allocation3 + $0xa0] ss:$8 sps:$4 sm:$0xff]  }
  0x3b   :  { %v2006_v58 = vld [vmem:[#allocation3 + $0xb4] ss:$8 sps:$4 sm:$0xff]   ;;  %v77_v60 = vld [vmem:[%s2585_s0 + $0x68] sm:$0xff]  ;;  %v2004_v61 = vld [vmem:[#allocation3 + $0xb0] ss:$8 sps:$4 sm:$0xff]  }
  0x3c   :  { %1682 = vmatmul.mubr.msk.bf16.vlgmr.msra.gmra.mrb[0].mxu0 %vm206_vm0, %v80_v16  ;;  %v76_v59 = vld [vmem:[%s2585_s0 + $0x60] sm:$0xff]  ;;  %v78_v2 = vld [vmem:[%s2585_s0 + $0x70] sm:$0xff]  ;;  %v79_v3 = vld [vmem:[%s2585_s0 + $0x78] sm:$0xff] }
  0x3d   :  { %273 = vmatprep.mubr.bf16.mxu0 %v2165_v1  ;;  %1014 = vmatpush1.bf16.msra.mxu0 %v1971_v19  ;;  %v2009_v62 = vld [vmem:[#allocation3 + $0xc4] ss:$8 sps:$4 sm:$0xff]   ;;  %v86_v63 = vpack.c.bf16 %v77_v60, %v76_v59  ;;  %v2007_v0 = vld [vmem:[#allocation3 + $0xc0] ss:$8 sps:$4 sm:$0xff]   ;;  %v87_v4 = vpack.c.bf16 %v79_v3, %v78_v2  ;;  %v2012_v5 = vld [vmem:[#allocation3 + $0xd4] ss:$8 sps:$4 sm:$0xff]  }
  0x3e   :  { %1015 = vmatprep.subr.bf16.mxu0 %v1976_v23  ;;  %1690 = vmatmul.mubr.msk.bf16.vlgmr.msra.gmra.mrb[0].mxu1 %vm206_vm0, %v80_v16  ;;  %v2010_v6 = vld [vmem:[#allocation3 + $0xd0] ss:$8 sps:$4 sm:$0xff]   ;;  %v2015_v7 = vld [vmem:[#allocation3 + $0xe4] ss:$8 sps:$4 sm:$0xff]   ;;  %v2013_v8 = vld [vmem:[#allocation3 + $0xe0] ss:$8 sps:$4 sm:$0xff]  }
  0x3f   :  { %386 = vmatprep.mubr.bf16.mxu1 %v2165_v1  ;;  %v2018_v9 = vld [vmem:[#allocation3 + $0xf4] ss:$8 sps:$4 sm:$0xff]   ;;  %v2016_v10 = vld [vmem:[#allocation3 + $0xf0] ss:$8 sps:$4 sm:$0xff]   ;;  %v2021_v11 = vld [vmem:[#allocation3 + $0x104] ss:$8 sps:$4 sm:$0xff]  }
  0x40   :  { %v104_v14 = vld [vmem:[%s2587_s2] sm:$0xf]  ;;  %v2071_v46 = vld [vmem:[#allocation6 + $0x50] sm:$0xff]  }
  0x41   :  { %1016 = vmatpush1.bf16.msra.mxu0 %v1974_v26  ;;  %v2389_v17 = vrot.slane %v104_v14, %v112_v15  ;;  %v116_v26 = vsub.s32 2, %v2375_v13  ;;  %v2067_v31 = vld [vmem:[#allocation6 + $0x40] sm:$0xff]  }
  0x42   :  { %1017 = vmatprep.subr.bf16.mxu0 %v1979_v27  ;;  %v2068_v32 = vld [vmem:[#allocation6] sm:$0xff]   ;;  %1779 = vmatprep.subr.bf16.mxu1 %v2067_v31 }
  0x43   :  { %v2397_v37 = vrot.slane %v104_v14, %v116_v26  ;;  %1780 = vmatpush3.bf16.msra.mxu1 %v2068_v32  ;;  %v2025_v32 = vld [vmem:[#allocation3 + $0x120] ss:$8 sps:$4 sm:$0xff]  }
  0x44   :  { %1683 = vmatmul.mubr.msk.bf16.gmra.mrb[4].mxu0 %vm206_vm0, %v81_v28 }
  0x45   :  { %283 = vmatprep.mubr.bf16.mxu0 %v2165_v1  ;;  %1018 = vmatpush1.bf16.msra.mxu0 %v1977_v29  ;;  %v120_v29 = vsub.s32 3, %v2375_v13 }
  0x46   :  { %1019 = vmatprep.subr.bf16.mxu0 %v1982_v30  ;;  %1691 = vmatmul.mubr.msk.bf16.gmra.mrb[4].mxu1 %vm206_vm0, %v81_v28 }
  0x47   :  { %396 = vmatprep.mubr.bf16.mxu1 %v2165_v1 }
  0x49   :  { %1020 = vmatpush1.bf16.msra.mxu0 %v1980_v33  ;;  %v2069_v33 = vld [vmem:[#allocation6 + $0x48] sm:$0xff]  }
  0x4a   :  { %1021 = vmatprep.subr.bf16.mxu0 %v1985_v34  ;;  %1781 = vmatprep.subr.bf16.mxu1 %v2069_v33 }
  0x4c   :  { %1684 = vmatmul.mubr.msk.bf16.gmra.mrb[8].mxu0 %vm206_vm0, %v82_v35 }
  0x4d   :  { %293 = vmatprep.mubr.bf16.mxu0 %v2165_v1  ;;  %1022 = vmatpush1.bf16.msra.mxu0 %v1983_v36 }
  0x4e   :  { %1023 = vmatprep.subr.bf16.mxu0 %v1988_v39  ;;  %1692 = vmatmul.mubr.msk.bf16.gmra.mrb[8].mxu1 %vm206_vm0, %v82_v35 }
  0x4f   :  { %406 = vmatprep.mubr.bf16.mxu1 %v2165_v1 }
  0x51   :  { %1024 = vmatpush1.bf16.msra.mxu0 %v1986_v40 }
  0x52   :  { %1025 = vmatprep.subr.bf16.mxu0 %v1991_v41  ;;  %v2399_v41 = vrot.slane %v104_v14, %v120_v29 }
  0x54   :  { %1685 = vmatmul.mubr.msk.bf16.gmra.mrb[12].mxu0 %vm206_vm0, %v83_v42 }
  0x55   :  { %303 = vmatprep.mubr.bf16.mxu0 %v2165_v1  ;;  %1026 = vmatpush1.bf16.msra.mxu0 %v1989_v43 }
  0x56   :  { %1027 = vmatprep.subr.bf16.mxu0 %v1994_v44  ;;  %1693 = vmatmul.mubr.msk.bf16.gmra.mrb[12].mxu1 %vm206_vm0, %v83_v42  ;;  %v2070_v42 = vld [vmem:[#allocation6 + $0x8] sm:$0xff]  }
  0x57   :  { %416 = vmatprep.mubr.bf16.mxu1 %v2165_v1  ;;  %1782 = vmatpush3.bf16.msra.mxu1 %v2070_v42 }
  0x58   :  { %1783 = vmatprep.subr.bf16.mxu1 %v2071_v46 }
  0x59   :  { %1028 = vmatpush1.bf16.msra.mxu0 %v1992_v47 }
  0x5a   :  { %1029 = vmatprep.subr.bf16.mxu0 %v1997_v48 }
  0x5c   :  { %1686 = vmatmul.mubr.msk.bf16.gmra.mrb[16].mxu0 %vm206_vm0, %v84_v49 }
  0x5d   :  { %313 = vmatprep.mubr.bf16.mxu0 %v2165_v1  ;;  %1030 = vmatpush1.bf16.msra.mxu0 %v1995_v50  ;;  %v2019_v50 = vld [vmem:[#allocation3 + $0x100] ss:$8 sps:$4 sm:$0xff]  }
  0x5e   :  { %1031 = vmatprep.subr.bf16.mxu0 %v2000_v51  ;;  %1694 = vmatmul.mubr.msk.bf16.gmra.mrb[16].mxu1 %vm206_vm0, %v84_v49 }
  0x5f   :  { %426 = vmatprep.mubr.bf16.mxu1 %v2165_v1 }
  0x61   :  { %1032 = vmatpush1.bf16.msra.mxu0 %v1998_v54 }
  0x62   :  { %1033 = vmatprep.subr.bf16.mxu0 %v2003_v55  ;;  %v2024_v55 = vld [vmem:[#allocation3 + $0x114] ss:$8 sps:$4 sm:$0xff]  }
  0x64   :  { %1687 = vmatmul.mubr.msk.bf16.gmra.mrb[20].mxu0 %vm206_vm0, %v85_v56 }
  0x65   :  { %323 = vmatprep.mubr.bf16.mxu0 %v2165_v1  ;;  %1034 = vmatpush1.bf16.msra.mxu0 %v2001_v57 }
  0x66   :  { %1035 = vmatprep.subr.bf16.mxu0 %v2006_v58  ;;  %1695 = vmatmul.mubr.msk.bf16.gmra.mrb[20].mxu1 %vm206_vm0, %v85_v56 }
  0x67   :  { %436 = vmatprep.mubr.bf16.mxu1 %v2165_v1 }
  0x69   :  { %1036 = vmatpush1.bf16.msra.mxu0 %v2004_v61 }
  0x6a   :  { %1037 = vmatprep.subr.bf16.mxu0 %v2009_v62  ;;  %v2072_v62 = vld [vmem:[#allocation6 + $0x10] sm:$0xff]  }
  0x6b   :  { %1784 = vmatpush3.bf16.msra.mxu1 %v2072_v62 }
  0x6c   :  { %1688 = vmatmul.mubr.msk.bf16.gmra.mrb[24].mxu0 %vm206_vm0, %v86_v63 }
  0x6d   :  { %333 = vmatprep.mubr.bf16.mxu0 %v2165_v1  ;;  %1038 = vmatpush1.bf16.msra.mxu0 %v2007_v0 }
  0x6e   :  { %1696 = vmatmul.mubr.msk.bf16.gmra.mrb[24].mxu1 %vm206_vm0, %v86_v63  ;;  %1039 = vmatprep.subr.bf16.mxu0 %v2012_v5 }
  0x6f   :  { %446 = vmatprep.mubr.bf16.mxu1 %v2165_v1  ;;  %v2378_v1 = vsub.s32 0, %v2375_v13 }
  0x71   :  { %1040 = vmatpush1.bf16.msra.mxu0 %v2010_v6  ;;  %v2385_v16 = vrot.slane %v104_v14, %v2378_v1  ;;  %v2022_v6 = vld [vmem:[#allocation3 + $0x110] ss:$8 sps:$4 sm:$0xff]  }
  0x72   :  { %1041 = vmatprep.subr.bf16.mxu0 %v2015_v7 }
  0x74   :  { %1689 = vmatmul.mubr.msk.bf16.gmra.mrb[28].mxu0 %vm206_vm0, %v87_v4 }
  0x75   :  { %1042 = vmatpush1.bf16.msra.mxu0 %v2013_v8 }
  0x76   :  { %1697 = vmatmul.mubr.msk.bf16.gmra.mrb[28].mxu1 %vm206_vm0, %v87_v4  ;;  %1043 = vmatprep.subr.bf16.mxu0 %v2018_v9  ;;  %v2073_v4 = vld [vmem:[#allocation6 + $0x58] sm:$0xff]  }
  0x77   :  { %1785 = vmatprep.subr.bf16.mxu1 %v2073_v4 }
  0x79   :  { %1044 = vmatpush1.bf16.msra.mxu0 %v2016_v10 }
  0x7a   :  { %1126 = vmatprep.subr.bf16.mxu0 %v2021_v11  ;;  %v2027_v11 = vld [vmem:[#allocation3 + $0x124] ss:$8 sps:$4 sm:$0xff]  }
 0x10f   :  { %v265_v18 = vpop.f32.mrb[0].mxu0 }
 0x110   :  { %v266_v19 = vadd.f32 %v265_v18, %v2385_v16  ;;  %v267_v20 = vpop.f32.mrb[1].mxu0 }
 0x111   :  { %v268_v21 = vadd.f32 %v267_v20, %v2389_v17  ;;  %v269_v22 = vpop.f32.mrb[2].mxu0  ;;  %v378_v51 = vpop.f32.mrb[0].mxu1 }
 0x112   :  { %v457_v23 = vmul.f32 0.2, %v266_v19  ;;  %v270_v24 = vadd.f32 %v269_v22, %v2385_v16  ;;  %v271_v25 = vpop.f32.mrb[3].mxu0  ;;  %v379_v56 = vadd.f32 %v378_v51, %v2397_v37  ;;  %v380_v57 = vpop.f32.mrb[1].mxu1 }
 0x113   :  { %v458_v27 = vmul.f32 0.2, %v268_v21  ;;  %v272_v28 = vadd.f32 %v271_v25, %v2389_v17  ;;  %v381_v60 = vadd.f32 %v380_v57, %v2399_v41  ;;  %v382_v61 = vpop.f32.mrb[2].mxu1 }
 0x114   :  { %v461_v30 = vmul.f32 0.2, %v270_v24  ;;  %v521_v35 = vmax.f32 %v266_v19, %v457_v23  ;;  %v459_v0 = vmul.f32 0.2, %v379_v56  ;;  %v383_v2 = vadd.f32 %v382_v61, %v2397_v37  ;;  %v384_v3 = vpop.f32.mrb[3].mxu1  ;;  %v2074_v23 = vld [vmem:[#allocation6 + $0x18] sm:$0xff]  }
 0x115   :  { %v462_v34 = vmul.f32 0.2, %v272_v28  ;;  %v522_v38 = vmax.f32 %v268_v21, %v458_v27  ;;  %v460_v7 = vmul.f32 0.2, %v381_v60  ;;  %v385_v8 = vadd.f32 %v384_v3, %v2399_v41  ;;  %1786 = vmatpush3.bf16.msra.mxu1 %v2074_v23  ;;  %v2033_v61 = vld [vmem:[#allocation3 + $0x144] ss:$8 sps:$4 sm:$0xff]  }
 0x116   :  { %v525_v36 = vmax.f32 %v270_v24, %v461_v30  ;;  %v523_v12 = vmax.f32 %v379_v56, %v459_v0  ;;  %v463_v14 = vmul.f32 0.2, %v383_v2  ;;  %v2028_v56 = vld [vmem:[#allocation3 + $0x130] ss:$8 sps:$4 sm:$0xff]  }
 0x117   :  { %v526_v39 = vmax.f32 %v272_v28, %v462_v34  ;;  %v275_v40 = vpop.f32.mrb[4].mxu0  ;;  %v524_v21 = vmax.f32 %v381_v60, %v460_v7  ;;  %v464_v22 = vmul.f32 0.2, %v385_v8  ;;  %v2075_v28 = vld [vmem:[#allocation6 + $0x60] sm:$0xff]  }
 0x118   :  { %v585_v43 = vpack.c.bf16 %v525_v36, %v521_v35  ;;  %v276_v44 = vadd.f32 %v275_v40, %v2385_v16  ;;  %v277_v45 = vpop.f32.mrb[5].mxu0  ;;  %v527_v27 = vmax.f32 %v383_v2, %v463_v14  ;;  %1787 = vmatprep.subr.bf16.mxu1 %v2075_v28 }
 0x119   :  { %v278_v47 = vadd.f32 %v277_v45, %v2389_v17  ;;  %v279_v48 = vpop.f32.mrb[6].mxu0  ;;  %v586_v49 = vpack.c.bf16 %v526_v39, %v522_v38  ;;  %v528_v33 = vmax.f32 %v385_v8, %v464_v22  ;;  %v388_v34 = vpop.f32.mrb[4].mxu1  ;;  %v2030_v39 = vld [vmem:[#allocation3 + $0x134] ss:$8 sps:$4 sm:$0xff]  }
 0x11a   :  { %v465_v52 = vmul.f32 0.2, %v276_v44  ;;  %v280_v53 = vadd.f32 %v279_v48, %v2385_v16  ;;  %v281_v54 = vpop.f32.mrb[7].mxu0  ;;  %v2412_v40 = vpack.c.bf16 %v527_v27, %v523_v12  ;;  %v389_v42 = vadd.f32 %v388_v34, %v2397_v37  ;;  %v2080_v34 = vld [vmem:[#allocation6 + $0x30] sm:$0xff]  }
 0x11b   :  { %v466_v58 = vmul.f32 0.2, %v278_v47  ;;  %v282_v59 = vadd.f32 %v281_v54, %v2389_v17  ;;  %1045 = vmatprep.mubr.bf16.mxu0 %v586_v49  ;;  %v2417_v48 = vpack.c.bf16 %v528_v33, %v524_v21  ;;  %v2076_v49 = vld [vmem:[#allocation6 + $0x20] sm:$0xff]   ;;  %v2077_v54 = vld [vmem:[#allocation6 + $0x68] sm:$0xff]  }
 0x11c   :  { %v469_v63 = vmul.f32 0.2, %v280_v53  ;;  %1046 = vmatmul.mubr.bf16.vlgmr.msra.gmra.mrb[32].mxu0 %v585_v43  ;;  %v529_v9 = vmax.f32 %v276_v44, %v465_v52  ;;  %v390_v43 = vpop.f32.mrb[5].mxu1  ;;  %v467_v51 = vmul.f32 0.2, %v389_v42  ;;  %1788 = vmatpush3.bf16.msra.mxu1 %v2076_v49 }
 0x11d   :  { %v470_v5 = vmul.f32 0.2, %v282_v59  ;;  %1127 = vmatpush1.bf16.msra.mxu0 %v2019_v50  ;;  %v530_v18 = vmax.f32 %v278_v47, %v466_v58  ;;  %v391_v46 = vadd.f32 %v390_v43, %v2399_v41  ;;  %v392_v47 = vpop.f32.mrb[6].mxu1  ;;  %1789 = vmatprep.subr.bf16.mxu1 %v2077_v54  ;;  %v2034_v43 = vld [vmem:[#allocation3 + $0x150] ss:$8 sps:$4 sm:$0xff]  }
 0x11e   :  { %v533_v10 = vmax.f32 %v280_v53, %v469_v63  ;;  %1128 = vmatprep.subr.bf16.mxu0 %v2024_v55  ;;  %v393_v52 = vadd.f32 %v392_v47, %v2397_v37  ;;  %v394_v53 = vpop.f32.mrb[7].mxu1  ;;  %v531_v62 = vmax.f32 %v389_v42, %v467_v51  ;;  %v2039_v49 = vld [vmem:[#allocation3 + $0x164] ss:$8 sps:$4 sm:$0xff]  }
 0x11f   :  { %v534_v19 = vmax.f32 %v282_v59, %v470_v5  ;;  %v285_v20 = vpop.f32.mrb[8].mxu0  ;;  %v468_v57 = vmul.f32 0.2, %v391_v46  ;;  %v395_v58 = vadd.f32 %v394_v53, %v2399_v41 }
 0x120   :  { %v286_v24 = vadd.f32 %v285_v20, %v2385_v16  ;;  %v287_v25 = vpop.f32.mrb[9].mxu0  ;;  %v589_v26 = vpack.c.bf16 %v533_v10, %v529_v9  ;;  %v471_v63 = vmul.f32 0.2, %v393_v52 }
 0x121   :  { %v288_v29 = vadd.f32 %v287_v25, %v2389_v17  ;;  %v289_v30 = vpop.f32.mrb[10].mxu0  ;;  %1129 = vmatpush1.bf16.msra.mxu0 %v2022_v6  ;;  %v590_v31 = vpack.c.bf16 %v534_v19, %v530_v18  ;;  %v532_v4 = vmax.f32 %v391_v46, %v468_v57  ;;  %v472_v5 = vmul.f32 0.2, %v395_v58  ;;  %v2078_v6 = vld [vmem:[#allocation6 + $0x28] sm:$0xff]   ;;  %v398_v21 = vpop.f32.mrb[8].mxu1 }
 0x122   :  { %v473_v35 = vmul.f32 0.2, %v286_v24  ;;  %v290_v36 = vadd.f32 %v289_v30, %v2385_v16  ;;  %v291_v38 = vpop.f32.mrb[11].mxu0  ;;  %1130 = vmatprep.subr.bf16.mxu0 %v2027_v11  ;;  %v535_v10 = vmax.f32 %v393_v52, %v471_v63  ;;  %v2079_v11 = vld [vmem:[#allocation6 + $0x70] sm:$0xff]   ;;  %v2031_v19 = vld [vmem:[#allocation3 + $0x140] ss:$8 sps:$4 sm:$0xff]   ;;  %1790 = vmatpush3.bf16.msra.mxu1 %v2078_v6 }
 0x123   :  { %v474_v44 = vmul.f32 0.2, %v288_v29  ;;  %v292_v45 = vadd.f32 %v291_v38, %v2389_v17  ;;  %1055 = vmatprep.mubr.bf16.mxu0 %v590_v31  ;;  %v536_v20 = vmax.f32 %v395_v58, %v472_v5  ;;  %v2036_v25 = vld [vmem:[#allocation3 + $0x154] ss:$8 sps:$4 sm:$0xff]   ;;  %v400_v27 = vpop.f32.mrb[9].mxu1  ;;  %1791 = vmatprep.subr.bf16.mxu1 %v2079_v11 }
 0x124   :  { %v477_v50 = vmul.f32 0.2, %v290_v36  ;;  %1056 = vmatmul.mubr.bf16.gmra.mrb[36].mxu0 %v589_v26  ;;  %v537_v59 = vmax.f32 %v286_v24, %v473_v35  ;;  %v399_v26 = vadd.f32 %v398_v21, %v2397_v37  ;;  %v2425_v28 = vpack.c.bf16 %v535_v10, %v531_v62 }
 0x125   :  { %v478_v55 = vmul.f32 0.2, %v292_v45  ;;  %1131 = vmatpush1.bf16.msra.mxu0 %v2025_v32  ;;  %v538_v0 = vmax.f32 %v288_v29, %v474_v44  ;;  %v401_v31 = vadd.f32 %v400_v27, %v2399_v41  ;;  %v402_v32 = vpop.f32.mrb[10].mxu1  ;;  %v2429_v33 = vpack.c.bf16 %v536_v20, %v532_v4 }
 0x126   :  { %v541_v60 = vmax.f32 %v290_v36, %v477_v50  ;;  %1132 = vmatprep.subr.bf16.mxu0 %v2030_v39  ;;  %v475_v36 = vmul.f32 0.2, %v399_v26  ;;  %v403_v38 = vadd.f32 %v402_v32, %v2397_v37  ;;  %v404_v39 = vpop.f32.mrb[11].mxu1  ;;  %1792 = vmatpush3.bf16.msra.mxu1 %v2080_v34 }
 0x127   :  { %v542_v2 = vmax.f32 %v292_v45, %v478_v55  ;;  %v295_v3 = vpop.f32.mrb[12].mxu0  ;;  %v476_v44 = vmul.f32 0.2, %v401_v31  ;;  %v405_v45 = vadd.f32 %v404_v39, %v2399_v41 }
 0x128   :  { %v296_v7 = vadd.f32 %v295_v3, %v2385_v16  ;;  %v297_v8 = vpop.f32.mrb[13].mxu0  ;;  %v593_v9 = vpack.c.bf16 %v541_v60, %v537_v59  ;;  %v539_v50 = vmax.f32 %v399_v26, %v475_v36  ;;  %v479_v51 = vmul.f32 0.2, %v403_v38 }
 0x129   :  { %v298_v12 = vadd.f32 %v297_v8, %v2389_v17  ;;  %v299_v14 = vpop.f32.mrb[14].mxu0  ;;  %1133 = vmatpush1.bf16.msra.mxu0 %v2028_v56  ;;  %v594_v18 = vpack.c.bf16 %v542_v2, %v538_v0  ;;  %v540_v55 = vmax.f32 %v401_v31, %v476_v44  ;;  %v480_v56 = vmul.f32 0.2, %v405_v45  ;;  %v2037_v0 = vld [vmem:[#allocation3 + $0x160] ss:$8 sps:$4 sm:$0xff]   ;;  %v408_v3 = vpop.f32.mrb[12].mxu1 }
 0x12a   :  { %v481_v22 = vmul.f32 0.2, %v296_v7  ;;  %v300_v23 = vadd.f32 %v299_v14, %v2385_v16  ;;  %v301_v24 = vpop.f32.mrb[15].mxu0  ;;  %1134 = vmatprep.subr.bf16.mxu0 %v2033_v61  ;;  %v543_v60 = vmax.f32 %v403_v38, %v479_v51  ;;  %v409_v8 = vadd.f32 %v408_v3, %v2397_v37  ;;  %v2045_v31 = vld [vmem:[#allocation3 + $0x184] ss:$8 sps:$4 sm:$0xff]  }
 0x12b   :  { %v482_v29 = vmul.f32 0.2, %v298_v12  ;;  %v302_v30 = vadd.f32 %v301_v24, %v2389_v17  ;;  %1065 = vmatprep.mubr.bf16.mxu0 %v594_v18  ;;  %v544_v2 = vmax.f32 %v405_v45, %v480_v56  ;;  %v2043_v51 = vld [vmem:[#allocation3 + $0x180] ss:$8 sps:$4 sm:$0xff]  }
 0x12c   :  { %v485_v35 = vmul.f32 0.2, %v300_v23  ;;  %1066 = vmatmul.mubr.bf16.gmra.mrb[40].mxu0 %v593_v9  ;;  %v545_v46 = vmax.f32 %v296_v7, %v481_v22  ;;  %v2042_v7 = vld [vmem:[#allocation3 + $0x174] ss:$8 sps:$4 sm:$0xff]   ;;  %v410_v9 = vpop.f32.mrb[13].mxu1  ;;  %v2437_v10 = vpack.c.bf16 %v543_v60, %v539_v50 }
 0x12d   :  { %v486_v42 = vmul.f32 0.2, %v302_v30  ;;  %1135 = vmatpush1.bf16.msra.mxu0 %v2031_v19  ;;  %v546_v52 = vmax.f32 %v298_v12, %v482_v29  ;;  %v411_v14 = vadd.f32 %v410_v9, %v2399_v41  ;;  %v412_v18 = vpop.f32.mrb[14].mxu1  ;;  %v2441_v19 = vpack.c.bf16 %v544_v2, %v540_v55 }
 0x12e   :  { %v549_v47 = vmax.f32 %v300_v23, %v485_v35  ;;  %1136 = vmatprep.subr.bf16.mxu0 %v2036_v25  ;;  %v483_v21 = vmul.f32 0.2, %v409_v8  ;;  %v413_v22 = vadd.f32 %v412_v18, %v2397_v37  ;;  %v414_v23 = vpop.f32.mrb[15].mxu1  ;;  %v2040_v25 = vld [vmem:[#allocation3 + $0x170] ss:$8 sps:$4 sm:$0xff]  }
 0x12f   :  { %v550_v53 = vmax.f32 %v302_v30, %v486_v42  ;;  %v305_v54 = vpop.f32.mrb[16].mxu0  ;;  %v484_v26 = vmul.f32 0.2, %v411_v14  ;;  %v415_v27 = vadd.f32 %v414_v23, %v2399_v41  ;;  %v2051_v18 = vld [vmem:[#allocation3 + $0x1a4] ss:$8 sps:$4 sm:$0xff]  }
 0x130   :  { %v306_v57 = vadd.f32 %v305_v54, %v2385_v16  ;;  %v307_v58 = vpop.f32.mrb[17].mxu0  ;;  %v597_v59 = vpack.c.bf16 %v549_v47, %v545_v46  ;;  %v547_v32 = vmax.f32 %v409_v8, %v483_v21  ;;  %v487_v34 = vmul.f32 0.2, %v413_v22  ;;  %v2046_v8 = vld [vmem:[#allocation3 + $0x190] ss:$8 sps:$4 sm:$0xff]  }
 0x131   :  { %v308_v61 = vadd.f32 %v307_v58, %v2389_v17  ;;  %v309_v62 = vpop.f32.mrb[18].mxu0  ;;  %1137 = vmatpush1.bf16.msra.mxu0 %v2034_v43  ;;  %v598_v63 = vpack.c.bf16 %v550_v53, %v546_v52  ;;  %v548_v39 = vmax.f32 %v411_v14, %v484_v26  ;;  %v488_v42 = vmul.f32 0.2, %v415_v27  ;;  %v418_v53 = vpop.f32.mrb[16].mxu1 }
 0x132   :  { %v489_v4 = vmul.f32 0.2, %v306_v57  ;;  %v310_v5 = vadd.f32 %v309_v62, %v2385_v16  ;;  %v311_v6 = vpop.f32.mrb[19].mxu0  ;;  %1138 = vmatprep.subr.bf16.mxu0 %v2039_v49  ;;  %v551_v46 = vmax.f32 %v413_v22, %v487_v34  ;;  %v419_v58 = vadd.f32 %v418_v53, %v2397_v37 }
 0x133   :  { %v490_v11 = vmul.f32 0.2, %v308_v61  ;;  %v312_v12 = vadd.f32 %v311_v6, %v2389_v17  ;;  %1075 = vmatprep.mubr.bf16.mxu0 %v598_v63  ;;  %v552_v52 = vmax.f32 %v415_v27, %v488_v42 }
 0x134   :  { %v493_v20 = vmul.f32 0.2, %v310_v5  ;;  %1076 = vmatmul.mubr.bf16.gmra.mrb[44].mxu0 %v597_v59  ;;  %v553_v29 = vmax.f32 %v306_v57, %v489_v4  ;;  %v2048_v57 = vld [vmem:[#allocation3 + $0x194] ss:$8 sps:$4 sm:$0xff]   ;;  %v420_v59 = vpop.f32.mrb[17].mxu1  ;;  %v2449_v60 = vpack.c.bf16 %v551_v46, %v547_v32 }
 0x135   :  { %v494_v24 = vmul.f32 0.2, %v312_v12  ;;  %1139 = vmatpush1.bf16.msra.mxu0 %v2037_v0  ;;  %v554_v35 = vmax.f32 %v308_v61, %v490_v11  ;;  %v421_v63 = vadd.f32 %v420_v59, %v2399_v41  ;;  %v422_v0 = vpop.f32.mrb[18].mxu1  ;;  %v2453_v2 = vpack.c.bf16 %v552_v52, %v548_v39 }
 0x136   :  { %v557_v30 = vmax.f32 %v310_v5, %v493_v20  ;;  %1140 = vmatprep.subr.bf16.mxu0 %v2042_v7  ;;  %v491_v4 = vmul.f32 0.2, %v419_v58  ;;  %v423_v5 = vadd.f32 %v422_v0, %v2397_v37  ;;  %v424_v6 = vpop.f32.mrb[19].mxu1 }
 0x137   :  { %v558_v36 = vmax.f32 %v312_v12, %v494_v24  ;;  %v315_v38 = vpop.f32.mrb[20].mxu0  ;;  %v492_v9 = vmul.f32 0.2, %v421_v63  ;;  %v425_v11 = vadd.f32 %v424_v6, %v2399_v41 }
 0x138   :  { %v316_v43 = vadd.f32 %v315_v38, %v2385_v16  ;;  %v317_v44 = vpop.f32.mrb[21].mxu0  ;;  %v601_v45 = vpack.c.bf16 %v557_v30, %v553_v29  ;;  %v555_v20 = vmax.f32 %v419_v58, %v491_v4  ;;  %v495_v21 = vmul.f32 0.2, %v423_v5  ;;  %v2057_v4 = vld [vmem:[#allocation3 + $0x1c4] ss:$8 sps:$4 sm:$0xff]  }
 0x139   :  { %v318_v47 = vadd.f32 %v317_v44, %v2389_v17  ;;  %v319_v49 = vpop.f32.mrb[22].mxu0  ;;  %1141 = vmatpush1.bf16.msra.mxu0 %v2040_v25  ;;  %v602_v50 = vpack.c.bf16 %v558_v36, %v554_v35  ;;  %v556_v25 = vmax.f32 %v421_v63, %v492_v9  ;;  %v496_v26 = vmul.f32 0.2, %v425_v11  ;;  %v2049_v36 = vld [vmem:[#allocation3 + $0x1a0] ss:$8 sps:$4 sm:$0xff]   ;;  %v428_v39 = vpop.f32.mrb[20].mxu1 }
 0x13a   :  { %v497_v54 = vmul.f32 0.2, %v316_v43  ;;  %v320_v55 = vadd.f32 %v319_v49, %v2385_v16  ;;  %v321_v56 = vpop.f32.mrb[23].mxu0  ;;  %1142 = vmatprep.subr.bf16.mxu0 %v2045_v31  ;;  %v559_v31 = vmax.f32 %v423_v5, %v495_v21  ;;  %v429_v46 = vadd.f32 %v428_v39, %v2397_v37 }
 0x13b   :  { %v498_v61 = vmul.f32 0.2, %v318_v47  ;;  %v322_v62 = vadd.f32 %v321_v56, %v2389_v17  ;;  %1085 = vmatprep.mubr.bf16.mxu0 %v602_v50  ;;  %v560_v38 = vmax.f32 %v425_v11, %v496_v26 }
 0x13c   :  { %v501_v3 = vmul.f32 0.2, %v320_v55  ;;  %1086 = vmatmul.mubr.bf16.gmra.mrb[48].mxu0 %v601_v45  ;;  %v561_v12 = vmax.f32 %v316_v43, %v497_v54  ;;  %v2054_v45 = vld [vmem:[#allocation3 + $0x1b4] ss:$8 sps:$4 sm:$0xff]   ;;  %v2461_v49 = vpack.c.bf16 %v559_v31, %v555_v20  ;;  %v499_v56 = vmul.f32 0.2, %v429_v46 }
 0x13d   :  { %v502_v7 = vmul.f32 0.2, %v322_v62  ;;  %1143 = vmatpush1.bf16.msra.mxu0 %v2043_v51  ;;  %v562_v22 = vmax.f32 %v318_v47, %v498_v61  ;;  %v430_v47 = vpop.f32.mrb[21].mxu1  ;;  %v2465_v54 = vpack.c.bf16 %v560_v38, %v556_v25  ;;  %v2052_v61 = vld [vmem:[#allocation3 + $0x1b0] ss:$8 sps:$4 sm:$0xff]  }
 0x13e   :  { %v565_v14 = vmax.f32 %v320_v55, %v501_v3  ;;  %1144 = vmatprep.subr.bf16.mxu0 %v2048_v57  ;;  %v431_v52 = vadd.f32 %v430_v47, %v2399_v41  ;;  %v432_v53 = vpop.f32.mrb[22].mxu1  ;;  %v563_v5 = vmax.f32 %v429_v46, %v499_v56  ;;  %v2055_v25 = vld [vmem:[#allocation3 + $0x1c0] ss:$8 sps:$4 sm:$0xff]   ;;  %v2063_v56 = vld [vmem:[#allocation3 + $0x1e4] ss:$8 sps:$4 sm:$0xff]  }
 0x13f   :  { %v566_v23 = vmax.f32 %v322_v62, %v502_v7  ;;  %v325_v24 = vpop.f32.mrb[24].mxu0  ;;  %v433_v57 = vadd.f32 %v432_v53, %v2397_v37  ;;  %v434_v58 = vpop.f32.mrb[23].mxu1 }
 0x140   :  { %v326_v27 = vadd.f32 %v325_v24, %v2385_v16  ;;  %v327_v29 = vpop.f32.mrb[25].mxu0  ;;  %v605_v30 = vpack.c.bf16 %v565_v14, %v561_v12  ;;  %v500_v62 = vmul.f32 0.2, %v431_v52  ;;  %v435_v63 = vadd.f32 %v434_v58, %v2399_v41 }
 0x141   :  { %v328_v32 = vadd.f32 %v327_v29, %v2389_v17  ;;  %v329_v34 = vpop.f32.mrb[26].mxu0  ;;  %1145 = vmatpush1.bf16.msra.mxu0 %v2046_v8  ;;  %v606_v35 = vpack.c.bf16 %v566_v23, %v562_v22  ;;  %v503_v6 = vmul.f32 0.2, %v433_v57 }
 0x142   :  { %v505_v42 = vmul.f32 0.2, %v326_v27  ;;  %v330_v43 = vadd.f32 %v329_v34, %v2385_v16  ;;  %v331_v44 = vpop.f32.mrb[27].mxu0  ;;  %1146 = vmatprep.subr.bf16.mxu0 %v2051_v18  ;;  %v564_v11 = vmax.f32 %v431_v52, %v500_v62  ;;  %v504_v12 = vmul.f32 0.2, %v435_v63 }
 0x143   :  { %v506_v50 = vmul.f32 0.2, %v328_v32  ;;  %v332_v51 = vadd.f32 %v331_v44, %v2389_v17  ;;  %1095 = vmatprep.mubr.bf16.mxu0 %v606_v35  ;;  %v567_v21 = vmax.f32 %v433_v57, %v503_v6 }
 0x144   :  { %v509_v55 = vmul.f32 0.2, %v330_v43  ;;  %1096 = vmatmul.mubr.bf16.gmra.mrb[52].mxu0 %v605_v30  ;;  %v569_v0 = vmax.f32 %v326_v27, %v505_v42  ;;  %v568_v26 = vmax.f32 %v435_v63, %v504_v12  ;;  %v438_v27 = vpop.f32.mrb[24].mxu1 }
 0x145   :  { %v510_v59 = vmul.f32 0.2, %v332_v51  ;;  %1147 = vmatpush1.bf16.msra.mxu0 %v2049_v36  ;;  %v570_v7 = vmax.f32 %v328_v32, %v506_v50  ;;  %v2060_v32 = vld [vmem:[#allocation3 + $0x1d4] ss:$8 sps:$4 sm:$0xff]   ;;  %v439_v34 = vadd.f32 %v438_v27, %v2397_v37  ;;  %v440_v35 = vpop.f32.mrb[25].mxu1  ;;  %v2473_v36 = vpack.c.bf16 %v567_v21, %v563_v5 }
 0x146   :  { %v573_v3 = vmax.f32 %v330_v43, %v509_v55  ;;  %1148 = vmatprep.subr.bf16.mxu0 %v2054_v45  ;;  %v441_v42 = vadd.f32 %v440_v35, %v2399_v41  ;;  %v442_v43 = vpop.f32.mrb[26].mxu1  ;;  %v2477_v44 = vpack.c.bf16 %v568_v26, %v564_v11  ;;  %v2061_v5 = vld [vmem:[#allocation3 + $0x1e0] ss:$8 sps:$4 sm:$0xff]  }
 0x147   :  { %v574_v8 = vmax.f32 %v332_v51, %v510_v59  ;;  %v335_v9 = vpop.f32.mrb[28].mxu0  ;;  %v443_v46 = vadd.f32 %v442_v43, %v2397_v37  ;;  %v444_v47 = vpop.f32.mrb[27].mxu1  ;;  %v2058_v51 = vld [vmem:[#allocation3 + $0x1d0] ss:$8 sps:$4 sm:$0xff]  }
 0x148   :  { %v336_v14 = vadd.f32 %v335_v9, %v2385_v16  ;;  %v337_v18 = vpop.f32.mrb[29].mxu0  ;;  %v609_v20 = vpack.c.bf16 %v573_v3, %v569_v0  ;;  %v508_v52 = vmul.f32 0.2, %v441_v42  ;;  %v445_v53 = vadd.f32 %v444_v47, %v2399_v41 }
 0x149   :  { %v338_v22 = vadd.f32 %v337_v18, %v2389_v17  ;;  %v339_v23 = vpop.f32.mrb[30].mxu0  ;;  %1149 = vmatpush1.bf16.msra.mxu0 %v2052_v61  ;;  %v610_v24 = vpack.c.bf16 %v574_v8, %v570_v7  ;;  %v511_v58 = vmul.f32 0.2, %v443_v46  ;;  %v448_v7 = vpop.f32.mrb[28].mxu1  ;;  %v2066_v8 = vld [vmem:[#allocation3 + $0x1f4] ss:$8 sps:$4 sm:$0xff]  }
 0x14a   :  { %v513_v29 = vmul.f32 0.2, %v336_v14  ;;  %v340_v30 = vadd.f32 %v339_v23, %v2385_v16  ;;  %v341_v31 = vpop.f32.mrb[31].mxu0  ;;  %1150 = vmatprep.subr.bf16.mxu0 %v2057_v4  ;;  %v507_v16 = vmul.f32 0.2, %v439_v34  ;;  %v572_v62 = vmax.f32 %v441_v42, %v508_v52  ;;  %v450_v11 = vpop.f32.mrb[29].mxu1 }
 0x14b   :  { %v514_v38 = vmul.f32 0.2, %v338_v22  ;;  %v342_v39 = vadd.f32 %v341_v31, %v2389_v17  ;;  %1105 = vmatprep.mubr.bf16.mxu0 %v610_v24  ;;  %v512_v63 = vmul.f32 0.2, %v445_v53  ;;  %v575_v3 = vmax.f32 %v443_v46, %v511_v58  ;;  %v452_v18 = vpop.f32.mrb[30].mxu1 }
 0x14c   :  { %v517_v45 = vmul.f32 0.2, %v340_v30  ;;  %1106 = vmatmul.mubr.bf16.gmra.mrb[56].mxu0 %v609_v20  ;;  %v577_v55 = vmax.f32 %v336_v14, %v513_v29  ;;  %v571_v57 = vmax.f32 %v439_v34, %v507_v16  ;;  %v449_v9 = vadd.f32 %v448_v7, %v2397_v37  ;;  %v454_v23 = vpop.f32.mrb[31].mxu1  ;;  %v2064_v24 = vld [vmem:[#allocation3 + $0x1f0] ss:$8 sps:$4 sm:$0xff]  }
 0x14d   :  { %v518_v50 = vmul.f32 0.2, %v342_v39  ;;  %1151 = vmatpush1.bf16.msra.mxu0 %v2055_v25  ;;  %v578_v59 = vmax.f32 %v338_v22, %v514_v38  ;;  %v576_v6 = vmax.f32 %v445_v53, %v512_v63  ;;  %v451_v14 = vadd.f32 %v450_v11, %v2399_v41 }
 0x14e   :  { %v581_v17 = vmax.f32 %v340_v30, %v517_v45  ;;  %1152 = vmatprep.subr.bf16.mxu0 %v2060_v32  ;;  %v611_v12 = vpack.c.bf16 %v575_v3, %v571_v57  ;;  %v515_v21 = vmul.f32 0.2, %v449_v9  ;;  %v453_v22 = vadd.f32 %v452_v18, %v2397_v37  ;;  %v2081_v37 = vld [vmem:[#allocation6 + $0x78] sm:$0xff]  }
 0x14f   :  { %v582_v61 = vmax.f32 %v342_v39, %v518_v50  ;;  %v612_v20 = vpack.c.bf16 %v576_v6, %v572_v62  ;;  %v516_v25 = vmul.f32 0.2, %v451_v14  ;;  %v455_v26 = vadd.f32 %v454_v23, %v2399_v41  ;;  %v2082_v41 = vld [vmem:[#allocation6 + $0x38] sm:$0xff]   ;;  %1793 = vmatprep.subr.bf16.mxu1 %v2081_v37 }
 0x150   :  { %v613_v0 = vpack.c.bf16 %v581_v17, %v577_v55  ;;  %v579_v27 = vmax.f32 %v449_v9, %v515_v21  ;;  %v519_v29 = vmul.f32 0.2, %v453_v22  ;;  %1794 = vmatpush3.bf16.msra.mxu1 %v2082_v41 }
 0x151   :  { %1153 = vmatpush1.bf16.msra.mxu0 %v2058_v51  ;;  %v614_v4 = vpack.c.bf16 %v582_v61, %v578_v59  ;;  %v580_v30 = vmax.f32 %v451_v14, %v516_v25  ;;  %v520_v31 = vmul.f32 0.2, %v455_v26 }
 0x152   :  { %1154 = vmatprep.subr.bf16.mxu0 %v2063_v56  ;;  %v583_v32 = vmax.f32 %v453_v22, %v519_v29 }
 0x153   :  { %1115 = vmatprep.mubr.bf16.mxu0 %v614_v4  ;;  %v584_v34 = vmax.f32 %v455_v26, %v520_v31 }
 0x154   :  { %1116 = vmatmul.mubr.bf16.gmra.mrb[60].mxu0 %v613_v0  ;;  %v615_v35 = vpack.c.bf16 %v583_v32, %v579_v27 }
 0x155   :  { %1155 = vmatpush1.bf16.msra.mxu0 %v2061_v5  ;;  %1158 = vmatprep.mubr.bf16.mxu0 %v2417_v48  ;;  %v616_v38 = vpack.c.bf16 %v584_v34, %v580_v30 }
 0x156   :  { %1156 = vmatprep.subr.bf16.mxu0 %v2066_v8 }
 0x159   :  { %1157 = vmatpush1.bf16.msra.mxu0 %v2064_v24 }
 0x15c   :  { %1159 = vmatmul.mubr.bf16.vlgmr.msra.gmra.mrb[32].mxu0 %v2412_v40  ;;  %v681_v40 = vld [vmem:[%s2589_s4] sm:$0x3] }
 0x15d   :  { %1168 = vmatprep.mubr.bf16.mxu0 %v2429_v33  ;;  %v2501_v48 = vrot.slane %v681_v40, %v2378_v1 }
 0x164   :  { %1169 = vmatmul.mubr.bf16.gmra.mrb[36].mxu0 %v2425_v28  ;;  %v2505_v28 = vrot.slane %v681_v40, %v112_v15 }
 0x165   :  { %1178 = vmatprep.mubr.bf16.mxu0 %v2441_v19 }
 0x16c   :  { %1179 = vmatmul.mubr.bf16.gmra.mrb[40].mxu0 %v2437_v10 }
 0x16d   :  { %1188 = vmatprep.mubr.bf16.mxu0 %v2453_v2 }
 0x174   :  { %1189 = vmatmul.mubr.bf16.gmra.mrb[44].mxu0 %v2449_v60 }
 0x175   :  { %1198 = vmatprep.mubr.bf16.mxu0 %v2465_v54 }
 0x17c   :  { %1199 = vmatmul.mubr.bf16.gmra.mrb[48].mxu0 %v2461_v49 }
 0x17d   :  { %1208 = vmatprep.mubr.bf16.mxu0 %v2477_v44 }
 0x184   :  { %1209 = vmatmul.mubr.bf16.gmra.mrb[52].mxu0 %v2473_v36 }
 0x185   :  { %1218 = vmatprep.mubr.bf16.mxu0 %v612_v20 }
 0x18c   :  { %1219 = vmatmul.mubr.bf16.gmra.mrb[56].mxu0 %v611_v12 }
 0x18d   :  { %1228 = vmatprep.mubr.bf16.mxu0 %v616_v38 }
 0x194   :  { %1229 = vmatmul.mubr.bf16.gmra.mrb[60].mxu0 %v615_v35 }
 0x22f   :  { %v1160_v33 = vpop.f32.mrb[32].mxu0 }
 0x230   :  { %v1872_v10 = vadd.f32 %v1160_v33, %v2501_v48  ;;  %v1162_v19 = vpop.f32.mrb[33].mxu0 }
 0x231   :  { %v1873_v60 = vadd.f32 %v1162_v19, %v2505_v28  ;;  %v1164_v2 = vpop.f32.mrb[34].mxu0 }
 0x232   :  { %v1239_v49 = vmul.f32 0.2, %v1872_v10  ;;  %v1874_v54 = vadd.f32 %v1164_v2, %v2501_v48  ;;  %v1166_v36 = vpop.f32.mrb[35].mxu0 }
 0x233   :  { %v1240_v39 = vmul.f32 0.2, %v1873_v60  ;;  %v1875_v42 = vadd.f32 %v1166_v36, %v2505_v28 }
 0x234   :  { %v1241_v43 = vmul.f32 0.2, %v1874_v54  ;;  %v1271_v45 = vmax.f32 %v1872_v10, %v1239_v49 }
 0x235   :  { %v1242_v44 = vmul.f32 0.2, %v1875_v42  ;;  %v1272_v15 = vmax.f32 %v1873_v60, %v1240_v39 }
 0x236   :  { %v1273_v13 = vmax.f32 %v1874_v54, %v1241_v43 }
 0x237   :  { %v1274_v16 = vmax.f32 %v1875_v42, %v1242_v44  ;;  %v1170_v46 = vpop.f32.mrb[36].mxu0 }
 0x238   :  { %v1303_v47 = vpack.c.bf16 %v1273_v13, %v1271_v45  ;;  %v1876_v50 = vadd.f32 %v1170_v46, %v2501_v48  ;;  %v1172_v51 = vpop.f32.mrb[37].mxu0 }
 0x239   :  { %v1877_v52 = vadd.f32 %v1172_v51, %v2505_v28  ;;  %v1174_v53 = vpop.f32.mrb[38].mxu0  ;;  %v1304_v55 = vpack.c.bf16 %v1274_v16, %v1272_v15 }
 0x23a   :  { %v1243_v17 = vmul.f32 0.2, %v1876_v50  ;;  %v1878_v56 = vadd.f32 %v1174_v53, %v2501_v48  ;;  %v1176_v57 = vpop.f32.mrb[39].mxu0 }
 0x23b   :  { %v1244_v58 = vmul.f32 0.2, %v1877_v52  ;;  %v1879_v59 = vadd.f32 %v1176_v57, %v2505_v28  ;;  %1486 = vmatprep.mubr.bf16.mxu1 %v1304_v55 }
 0x23c   :  { %v1245_v61 = vmul.f32 0.2, %v1878_v56  ;;  %1487 = vmatmul.mubr.bf16.vlgmr.msra.gmra.mrb[32].mxu1 %v1303_v47  ;;  %v1275_v63 = vmax.f32 %v1876_v50, %v1243_v17 }
 0x23d   :  { %v1246_v62 = vmul.f32 0.2, %v1879_v59  ;;  %v1276_v3 = vmax.f32 %v1877_v52, %v1244_v58 }
 0x23e   :  { %v1277_v0 = vmax.f32 %v1878_v56, %v1245_v61 }
 0x23f   :  { %v1278_v4 = vmax.f32 %v1879_v59, %v1246_v62  ;;  %v1180_v5 = vpop.f32.mrb[40].mxu0 }
 0x240   :  { %v1880_v6 = vadd.f32 %v1180_v5, %v2501_v48  ;;  %v1182_v7 = vpop.f32.mrb[41].mxu0  ;;  %v1305_v8 = vpack.c.bf16 %v1277_v0, %v1275_v63 }
 0x241   :  { %v1881_v9 = vadd.f32 %v1182_v7, %v2505_v28  ;;  %v1184_v11 = vpop.f32.mrb[42].mxu0  ;;  %v1306_v12 = vpack.c.bf16 %v1278_v4, %v1276_v3 }
 0x242   :  { %v1247_v14 = vmul.f32 0.2, %v1880_v6  ;;  %v1882_v18 = vadd.f32 %v1184_v11, %v2501_v48  ;;  %v1186_v20 = vpop.f32.mrb[43].mxu0 }
 0x243   :  { %v1248_v21 = vmul.f32 0.2, %v1881_v9  ;;  %v1883_v22 = vadd.f32 %v1186_v20, %v2505_v28  ;;  %1494 = vmatprep.mubr.bf16.mxu1 %v1306_v12 }
 0x244   :  { %v1249_v23 = vmul.f32 0.2, %v1882_v18  ;;  %1495 = vmatmul.mubr.bf16.gmra.mrb[36].mxu1 %v1305_v8  ;;  %v1279_v25 = vmax.f32 %v1880_v6, %v1247_v14 }
 0x245   :  { %v1250_v24 = vmul.f32 0.2, %v1883_v22  ;;  %v1280_v27 = vmax.f32 %v1881_v9, %v1248_v21 }
 0x246   :  { %v1281_v26 = vmax.f32 %v1882_v18, %v1249_v23 }
 0x247   :  { %v1282_v29 = vmax.f32 %v1883_v22, %v1250_v24  ;;  %v1190_v30 = vpop.f32.mrb[44].mxu0 }
 0x248   :  { %v1884_v31 = vadd.f32 %v1190_v30, %v2501_v48  ;;  %v1192_v32 = vpop.f32.mrb[45].mxu0  ;;  %v1307_v34 = vpack.c.bf16 %v1281_v26, %v1279_v25 }
 0x249   :  { %v1885_v35 = vadd.f32 %v1192_v32, %v2505_v28  ;;  %v1194_v38 = vpop.f32.mrb[46].mxu0  ;;  %v1308_v37 = vpack.c.bf16 %v1282_v29, %v1280_v27 }
 0x24a   :  { %v1251_v41 = vmul.f32 0.2, %v1884_v31  ;;  %v1886_v40 = vadd.f32 %v1194_v38, %v2501_v48  ;;  %v1196_v33 = vpop.f32.mrb[47].mxu0 }
 0x24b   :  { %v1252_v10 = vmul.f32 0.2, %v1885_v35  ;;  %v1887_v19 = vadd.f32 %v1196_v33, %v2505_v28  ;;  %1502 = vmatprep.mubr.bf16.mxu1 %v1308_v37 }
 0x24c   :  { %v1253_v60 = vmul.f32 0.2, %v1886_v40  ;;  %1503 = vmatmul.mubr.bf16.gmra.mrb[40].mxu1 %v1307_v34  ;;  %v1283_v49 = vmax.f32 %v1884_v31, %v1251_v41 }
 0x24d   :  { %v1254_v2 = vmul.f32 0.2, %v1887_v19  ;;  %v1284_v36 = vmax.f32 %v1885_v35, %v1252_v10 }
 0x24e   :  { %v1285_v54 = vmax.f32 %v1886_v40, %v1253_v60 }
 0x24f   :  { %v1286_v39 = vmax.f32 %v1887_v19, %v1254_v2  ;;  %v1200_v42 = vpop.f32.mrb[48].mxu0 }
 0x250   :  { %v1888_v43 = vadd.f32 %v1200_v42, %v2501_v48  ;;  %v1202_v44 = vpop.f32.mrb[49].mxu0  ;;  %v1309_v45 = vpack.c.bf16 %v1285_v54, %v1283_v49 }
 0x251   :  { %v1889_v13 = vadd.f32 %v1202_v44, %v2505_v28  ;;  %v1204_v15 = vpop.f32.mrb[50].mxu0  ;;  %v1310_v16 = vpack.c.bf16 %v1286_v39, %v1284_v36 }
 0x252   :  { %v1255_v46 = vmul.f32 0.2, %v1888_v43  ;;  %v1890_v47 = vadd.f32 %v1204_v15, %v2501_v48  ;;  %v1206_v50 = vpop.f32.mrb[51].mxu0 }
 0x253   :  { %v1256_v51 = vmul.f32 0.2, %v1889_v13  ;;  %v1891_v52 = vadd.f32 %v1206_v50, %v2505_v28  ;;  %1510 = vmatprep.mubr.bf16.mxu1 %v1310_v16 }
 0x254   :  { %v1257_v53 = vmul.f32 0.2, %v1890_v47  ;;  %1511 = vmatmul.mubr.bf16.gmra.mrb[44].mxu1 %v1309_v45  ;;  %v1287_v17 = vmax.f32 %v1888_v43, %v1255_v46 }
 0x255   :  { %v1258_v55 = vmul.f32 0.2, %v1891_v52  ;;  %v1288_v57 = vmax.f32 %v1889_v13, %v1256_v51 }
 0x256   :  { %v1289_v56 = vmax.f32 %v1890_v47, %v1257_v53 }
 0x257   :  { %v1290_v58 = vmax.f32 %v1891_v52, %v1258_v55  ;;  %v1210_v59 = vpop.f32.mrb[52].mxu0  ;;  %v2166_v55 = vmov 0.0  }
 0x258   :  { %v1892_v61 = vadd.f32 %v1210_v59, %v2501_v48  ;;  %v1212_v62 = vpop.f32.mrb[53].mxu0  ;;  %v1311_v63 = vpack.c.bf16 %v1289_v56, %v1287_v17  ;;  %1852 = vmatprep.subr.bf16.mxu1 %v2166_v55  ;;  %v2544_v17 = vld [vmem:[%s2591_s6] ss:$0 sm:$0xff] }
 0x259   :  { %v1893_v0 = vadd.f32 %v1212_v62, %v2505_v28  ;;  %v1214_v3 = vpop.f32.mrb[54].mxu0  ;;  %v1312_v4 = vpack.c.bf16 %v1290_v58, %v1288_v57 }
 0x25a   :  { %v1259_v5 = vmul.f32 0.2, %v1892_v61  ;;  %v1894_v6 = vadd.f32 %v1214_v3, %v2501_v48  ;;  %v1216_v7 = vpop.f32.mrb[55].mxu0 }
 0x25b   :  { %v1260_v8 = vmul.f32 0.2, %v1893_v0  ;;  %v1895_v9 = vadd.f32 %v1216_v7, %v2505_v28  ;;  %1518 = vmatprep.mubr.bf16.mxu1 %v1312_v4 }
 0x25c   :  { %v1261_v11 = vmul.f32 0.2, %v1894_v6  ;;  %1519 = vmatmul.mubr.bf16.gmra.mrb[48].mxu1 %v1311_v63  ;;  %v1291_v14 = vmax.f32 %v1892_v61, %v1259_v5 }
 0x25d   :  { %v1262_v12 = vmul.f32 0.2, %v1895_v9  ;;  %v1292_v20 = vmax.f32 %v1893_v0, %v1260_v8 }
 0x25e   :  { %v1293_v18 = vmax.f32 %v1894_v6, %v1261_v11 }
 0x25f   :  { %v1294_v21 = vmax.f32 %v1895_v9, %v1262_v12  ;;  %v1220_v22 = vpop.f32.mrb[56].mxu0 }
 0x260   :  { %v1896_v23 = vadd.f32 %v1220_v22, %v2501_v48  ;;  %v1222_v24 = vpop.f32.mrb[57].mxu0  ;;  %v1313_v25 = vpack.c.bf16 %v1293_v18, %v1291_v14 }
 0x261   :  { %v1897_v26 = vadd.f32 %v1222_v24, %v2505_v28  ;;  %v1224_v27 = vpop.f32.mrb[58].mxu0  ;;  %v1314_v29 = vpack.c.bf16 %v1294_v21, %v1292_v20 }
 0x262   :  { %v1263_v30 = vmul.f32 0.2, %v1896_v23  ;;  %v1898_v31 = vadd.f32 %v1224_v27, %v2501_v48  ;;  %v1226_v32 = vpop.f32.mrb[59].mxu0 }
 0x263   :  { %v1264_v34 = vmul.f32 0.2, %v1897_v26  ;;  %v1899_v35 = vadd.f32 %v1226_v32, %v2505_v28  ;;  %1526 = vmatprep.mubr.bf16.mxu1 %v1314_v29 }
 0x264   :  { %v1265_v38 = vmul.f32 0.2, %v1898_v31  ;;  %1527 = vmatmul.mubr.bf16.gmra.mrb[52].mxu1 %v1313_v25  ;;  %v1295_v41 = vmax.f32 %v1896_v23, %v1263_v30 }
 0x265   :  { %v1266_v37 = vmul.f32 0.2, %v1899_v35  ;;  %v1296_v33 = vmax.f32 %v1897_v26, %v1264_v34 }
 0x266   :  { %v1297_v40 = vmax.f32 %v1898_v31, %v1265_v38 }
 0x267   :  { %v1298_v10 = vmax.f32 %v1899_v35, %v1266_v37  ;;  %v1230_v19 = vpop.f32.mrb[60].mxu0 }
 0x268   :  { %v1900_v60 = vadd.f32 %v1230_v19, %v2501_v48  ;;  %v1232_v2 = vpop.f32.mrb[61].mxu0  ;;  %v1315_v49 = vpack.c.bf16 %v1297_v40, %v1295_v41 }
 0x269   :  { %v1901_v54 = vadd.f32 %v1232_v2, %v2505_v28  ;;  %v1234_v36 = vpop.f32.mrb[62].mxu0  ;;  %v1316_v39 = vpack.c.bf16 %v1298_v10, %v1296_v33 }
 0x26a   :  { %v1267_v42 = vmul.f32 0.2, %v1900_v60  ;;  %v1902_v43 = vadd.f32 %v1234_v36, %v2501_v48  ;;  %v1236_v44 = vpop.f32.mrb[63].mxu0  ;;  %v1593_v48 = vld [vmem:[#allocation2] sm:$0x1] }
 0x26b   :  { %v1268_v45 = vmul.f32 0.2, %v1901_v54  ;;  %v1903_v13 = vadd.f32 %v1236_v44, %v2505_v28  ;;  %1534 = vmatprep.mubr.bf16.mxu1 %v1316_v39  ;;  %1596 = vperm.xlu0 %1946, %v1593_v48  }
 0x26c   :  { %v1269_v15 = vmul.f32 0.2, %v1902_v43  ;;  %1535 = vmatmul.mubr.bf16.gmra.mrb[56].mxu1 %v1315_v49  ;;  %v1299_v46 = vmax.f32 %v1900_v60, %v1267_v42 }
 0x26d   :  { %v1270_v16 = vmul.f32 0.2, %v1903_v13  ;;  %v1300_v50 = vmax.f32 %v1901_v54, %v1268_v45 }
 0x26e   :  { %v1301_v47 = vmax.f32 %v1902_v43, %v1269_v15 }
 0x26f   :  { %v1302_v51 = vmax.f32 %v1903_v13, %v1270_v16 }
 0x270   :  { %v1317_v52 = vpack.c.bf16 %v1301_v47, %v1299_v46 }
 0x271   :  { %v1318_v53 = vpack.c.bf16 %v1302_v51, %v1300_v50 }
 0x273   :  { %1542 = vmatprep.mubr.bf16.mxu1 %v1318_v53 }
 0x274   :  { %1543 = vmatmul.mubr.bf16.gmra.mrb[60].mxu1 %v1317_v52 }
 0x275   :  { %1868 = vmatprep.mubr.msk.bf16.mxu1 %vm2167_vm1, %v2166_v55 }
 0x30f   :  { %v1795_v28 = vpop.f32.mrb[32].mxu1 }
 0x310   :  { %v1796_v56 = vpop.f32.mrb[33].mxu1 }
 0x311   :  { %v1797_v57 = vadd.f32 %v1796_v56, %v1795_v28  ;;  %v1798_v58 = vpop.f32.mrb[34].mxu1 }
 0x312   :  { %v1799_v59 = vpop.f32.mrb[35].mxu1 }
 0x313   :  { %v1489_v61 = vadd.f32 %v1797_v57, %v2544_v17  ;;  %v1800_v62 = vadd.f32 %v1799_v59, %v1798_v58 }
 0x315   :  { %v1551_v63 = vmul.f32 0.2, %v1489_v61  ;;  %v1492_v0 = vadd.f32 %v1800_v62, %v2544_v17 }
 0x317   :  { %v1552_v3 = vmul.f32 0.2, %v1492_v0  ;;  %v1801_v4 = vpop.f32.mrb[36].mxu1  ;;  %v1567_v6 = vmax.f32 %v1489_v61, %v1551_v63 }
 0x318   :  { %v1802_v5 = vpop.f32.mrb[37].mxu1 }
 0x319   :  { %v1568_v7 = vmax.f32 %v1492_v0, %v1552_v3  ;;  %v1803_v8 = vadd.f32 %v1802_v5, %v1801_v4  ;;  %v1804_v9 = vpop.f32.mrb[38].mxu1 }
 0x31a   :  { %v1805_v11 = vpop.f32.mrb[39].mxu1 }
 0x31b   :  { %v1585_v12 = vpack.c.bf16 %v1568_v7, %v1567_v6  ;;  %v1497_v14 = vadd.f32 %v1803_v8, %v2544_v17  ;;  %v1806_v18 = vadd.f32 %v1805_v11, %v1804_v9 }
 0x31d   :  { %v1553_v20 = vmul.f32 0.2, %v1497_v14  ;;  %v1500_v21 = vadd.f32 %v1806_v18, %v2544_v17  ;;  %1853 = vmatpush3.bf16.xpose.msra.mxu1 %v1585_v12 }
 0x31e   :  { %1854 = vmatprep.subr.bf16.mxu1 %v2166_v55 }
 0x31f   :  { %v1554_v22 = vmul.f32 0.2, %v1500_v21  ;;  %v1807_v23 = vpop.f32.mrb[40].mxu1  ;;  %v1569_v25 = vmax.f32 %v1497_v14, %v1553_v20 }
 0x320   :  { %v1808_v24 = vpop.f32.mrb[41].mxu1 }
 0x321   :  { %v1570_v26 = vmax.f32 %v1500_v21, %v1554_v22  ;;  %v1809_v27 = vadd.f32 %v1808_v24, %v1807_v23  ;;  %v1810_v29 = vpop.f32.mrb[42].mxu1 }
 0x322   :  { %v1811_v30 = vpop.f32.mrb[43].mxu1 }
 0x323   :  { %v1586_v31 = vpack.c.bf16 %v1570_v26, %v1569_v25  ;;  %v1505_v32 = vadd.f32 %v1809_v27, %v2544_v17  ;;  %v1812_v34 = vadd.f32 %v1811_v30, %v1810_v29 }
 0x325   :  { %v1555_v35 = vmul.f32 0.2, %v1505_v32  ;;  %v1508_v38 = vadd.f32 %v1812_v34, %v2544_v17  ;;  %1855 = vmatpush3.bf16.xpose.msra.mxu1 %v1586_v31 }
 0x326   :  { %1856 = vmatprep.subr.bf16.mxu1 %v2166_v55 }
 0x327   :  { %v1556_v37 = vmul.f32 0.2, %v1508_v38  ;;  %v1813_v41 = vpop.f32.mrb[44].mxu1  ;;  %v1571_v33 = vmax.f32 %v1505_v32, %v1555_v35 }
 0x328   :  { %v1814_v40 = vpop.f32.mrb[45].mxu1 }
 0x329   :  { %v1572_v10 = vmax.f32 %v1508_v38, %v1556_v37  ;;  %v1815_v19 = vadd.f32 %v1814_v40, %v1813_v41  ;;  %v1816_v60 = vpop.f32.mrb[46].mxu1 }
 0x32a   :  { %v1817_v2 = vpop.f32.mrb[47].mxu1 }
 0x32b   :  { %v1587_v49 = vpack.c.bf16 %v1572_v10, %v1571_v33  ;;  %v1513_v54 = vadd.f32 %v1815_v19, %v2544_v17  ;;  %v1818_v36 = vadd.f32 %v1817_v2, %v1816_v60 }
 0x32d   :  { %v1557_v39 = vmul.f32 0.2, %v1513_v54  ;;  %v1516_v42 = vadd.f32 %v1818_v36, %v2544_v17  ;;  %1857 = vmatpush3.bf16.xpose.msra.mxu1 %v1587_v49  ;;  %v1583_v49 = vld [vmem:[%s2592_s7] sm:$0x1]  ;;  %v1597_v36 = vpop.permute.xlu0 %1596  ;;  %s2131_s7 = scalar_lea.vmem %s1657_s13, 16 }
 0x32e   :  { %1858 = vmatprep.subr.bf16.mxu1 %v2166_v55  ;;  %p2132_p2 = scmp.ne.s32.totalorder %s1657_s13, %s2131_s7  ;;  %p2137_p4 = scmp.lt.s32.totalorder %s2135_s3, %s2131_s7 }
 0x32f   :  { %v1558_v43 = vmul.f32 0.2, %v1516_v42  ;;  %v1819_v44 = vpop.f32.mrb[48].mxu1  ;;  %v1573_v13 = vmax.f32 %v1513_v54, %v1557_v39  ;;  %v1584_v54 = vpack.c.bf16 %v1583_v49, %v1583_v49  ;;  %v1602_v39 = vrot.slane %v1597_v36, %v2378_v1 }
 0x330   :  { %v1820_v45 = vpop.f32.mrb[49].mxu1  ;;  %p2138_p5 = por %p2137_p4, %p2136_p3 }
 0x331   :  { %v1574_v15 = vmax.f32 %v1516_v42, %v1558_v43  ;;  %v1821_v16 = vadd.f32 %v1820_v45, %v1819_v44  ;;  %v1822_v46 = vpop.f32.mrb[50].mxu1 }
 0x332   :  { %v1823_v47 = vpop.f32.mrb[51].mxu1  ;;  %p2139_p6 = pnand %p2138_p5, %p2132_p2 }
 0x333   :  { %v1588_v50 = vpack.c.bf16 %v1574_v15, %v1573_v13  ;;  %v1521_v51 = vadd.f32 %v1821_v16, %v2544_v17  ;;  %v1824_v52 = vadd.f32 %v1823_v47, %v1822_v46 }
 0x335   :  { %v1559_v53 = vmul.f32 0.2, %v1521_v51  ;;  %v1524_v48 = vadd.f32 %v1824_v52, %v2544_v17  ;;  %1859 = vmatpush3.bf16.xpose.msra.mxu1 %v1588_v50 }
 0x336   :  { %1860 = vmatprep.subr.bf16.mxu1 %v2166_v55 }
 0x337   :  { %v1560_v28 = vmul.f32 0.2, %v1524_v48  ;;  %v1825_v56 = vpop.f32.mrb[52].mxu1  ;;  %v1575_v58 = vmax.f32 %v1521_v51, %v1559_v53 }
 0x338   :  { %v1826_v57 = vpop.f32.mrb[53].mxu1 }
 0x339   :  { %v1576_v59 = vmax.f32 %v1524_v48, %v1560_v28  ;;  %v1827_v61 = vadd.f32 %v1826_v57, %v1825_v56  ;;  %v1828_v62 = vpop.f32.mrb[54].mxu1 }
 0x33a   :  { %v1829_v63 = vpop.f32.mrb[55].mxu1 }
 0x33b   :  { %v1589_v0 = vpack.c.bf16 %v1576_v59, %v1575_v58  ;;  %v1529_v3 = vadd.f32 %v1827_v61, %v2544_v17  ;;  %v1830_v4 = vadd.f32 %v1829_v63, %v1828_v62 }
 0x33d   :  { %v1561_v5 = vmul.f32 0.2, %v1529_v3  ;;  %v1532_v6 = vadd.f32 %v1830_v4, %v2544_v17  ;;  %1861 = vmatpush3.bf16.xpose.msra.mxu1 %v1589_v0 }
 0x33e   :  { %1862 = vmatprep.subr.bf16.mxu1 %v2166_v55 }
 0x33f   :  { %v1562_v7 = vmul.f32 0.2, %v1532_v6  ;;  %v1831_v8 = vpop.f32.mrb[56].mxu1  ;;  %v1577_v11 = vmax.f32 %v1529_v3, %v1561_v5 }
 0x340   :  { %v1832_v9 = vpop.f32.mrb[57].mxu1 }
 0x341   :  { %v1578_v12 = vmax.f32 %v1532_v6, %v1562_v7  ;;  %v1833_v14 = vadd.f32 %v1832_v9, %v1831_v8  ;;  %v1834_v18 = vpop.f32.mrb[58].mxu1 }
 0x342   :  { %v1835_v20 = vpop.f32.mrb[59].mxu1 }
 0x343   :  { %v1590_v21 = vpack.c.bf16 %v1578_v12, %v1577_v11  ;;  %v1537_v22 = vadd.f32 %v1833_v14, %v2544_v17  ;;  %v1836_v23 = vadd.f32 %v1835_v20, %v1834_v18 }
 0x345   :  { %v1563_v24 = vmul.f32 0.2, %v1537_v22  ;;  %v1540_v25 = vadd.f32 %v1836_v23, %v2544_v17  ;;  %1863 = vmatpush3.bf16.xpose.msra.mxu1 %v1590_v21 }
 0x346   :  { %1864 = vmatprep.subr.bf16.mxu1 %v2166_v55 }
 0x347   :  { %v1564_v26 = vmul.f32 0.2, %v1540_v25  ;;  %v1837_v27 = vpop.f32.mrb[60].mxu1  ;;  %v1579_v30 = vmax.f32 %v1537_v22, %v1563_v24 }
 0x348   :  { %v1838_v29 = vpop.f32.mrb[61].mxu1 }
 0x349   :  { %v1580_v31 = vmax.f32 %v1540_v25, %v1564_v26  ;;  %v1839_v32 = vadd.f32 %v1838_v29, %v1837_v27  ;;  %v1840_v34 = vpop.f32.mrb[62].mxu1 }
 0x34a   :  { %v1841_v35 = vpop.f32.mrb[63].mxu1 }
 0x34b   :  { %v1591_v38 = vpack.c.bf16 %v1580_v31, %v1579_v30  ;;  %v1545_v37 = vadd.f32 %v1839_v32, %v2544_v17  ;;  %v1842_v41 = vadd.f32 %v1841_v35, %v1840_v34 }
 0x34d   :  { %v1565_v40 = vmul.f32 0.2, %v1545_v37  ;;  %v1548_v33 = vadd.f32 %v1842_v41, %v2544_v17  ;;  %1865 = vmatpush3.bf16.xpose.msra.mxu1 %v1591_v38 }
 0x34e   :  { %1866 = vmatprep.subr.bf16.mxu1 %v2166_v55 }
 0x34f   :  { %v1566_v10 = vmul.f32 0.2, %v1548_v33  ;;  %v1581_v19 = vmax.f32 %v1545_v37, %v1565_v40 }
 0x351   :  { %v1582_v60 = vmax.f32 %v1548_v33, %v1566_v10 }
 0x353   :  { %v1592_v2 = vpack.c.bf16 %v1582_v60, %v1581_v19 }
 0x355   :  { %1867 = vmatpush3.bf16.xpose.msra.mxu1 %v1592_v2 }
 0x35c   :  { %1869 = vmatmul.mubr.bf16.vlgmr.msra.gmra.mrb[64].mxu1 %v1584_v54 }
 0x42f   :  { %v1637_v42 = vpop.f32.mrb[64].mxu1 }
 0x430   :  { %v1638_v43 = vadd.f32 %v1637_v42, %v1602_v39  ;;  %v1870_v17 = vpop.f32.mrb[65].mxu1 }
 0x431   :  { %v1640_v44 = vpop.f32.mrb[66].mxu1 }
 0x432   :  { %v1643_v45 = vsub.f32 0.0, %v1638_v43  ;;  %v1871_v55 = vpop.f32.mrb[67].mxu1 }
 0x434   :  { %v1644_v13 = vmul.f32 1.442695, %v1643_v45 }
 0x436   :  { %2083 = vpow2.f32 %v1644_v13 }
 0x440   :  { %v2084_v15 = vpop.eup %2083 }
 0x441   :  { %v1646_v16 = vadd.f32 1.0, %v2084_v15 }
 0x443   :  { %2085 = vrcp.f32 %v1646_v16 }
 0x44d   :  { %v2086_v46 = vpop.eup %2085 }
 0x44e   :  { %1649 = vst [vmem:[#allocation8] sm:$0x1] %v2086_v46 }
 0x44f   :  { %2142 = shalt.err (!%p2139_p6)
}
 0x450   :  { %s2143_s15 = scalar_lea.hbm %s2594_s9, 16 }
 0x451   :  { %p2144_p7 = scmp.ne.s32.totalorder %s2594_s9, %s2143_s15  ;;  %p2147_p8 = scmp.lt.u32.totalorder %s2143_s15, %s2594_s9 }
 0x453   :  { %p2149_p9 = pnand %p2147_p8, %p2144_p7 }
 0x455   :  { %2152 = shalt.err (!%p2149_p9)
}
 0x456   :  { %1659 = dma.vmem_to_hbm [thread:$0]  %s1657_s13, 16, %s2594_s9, [#allocation5]  }
 0x457   :  { %2157 = dma.done.wait [#allocation5], 16  }
 0x458   :  { %2158 = vsyncadd [#allocation5], 4294967280 }
 0x459   :  { %1663 = vsyncpa [#allocation4], 1 }
 0x45a   :  { %1664 = vsyncpa [#allocation7], 1 }
 0x45b   :  { %1665 = vsyncpa [#allocation5], 1 }

</bundles_post_ra>
